<compile_context>
chip_gen: v5e
topology: v5e:2x2
jax: 0.10.0
libtpu: 0.0.40
codegen_flags: <defaults>
</compile_context>

<pallas_src>
import functools
import math

import jax
import jax.numpy as jnp
from jax.experimental import pallas as pl
from jax.experimental.pallas import tpu as pltpu


# ------------------------------ kernel helpers ------------------------------ #

def _layer_norm_f32(v, gamma, beta, eps):
    """LayerNorm over the last axis, f32 math.  v:(T,D) gamma/beta:(1,D)."""
    mu = jnp.mean(v, axis=-1, keepdims=True)
    var = jnp.mean(jnp.square(v - mu), axis=-1, keepdims=True)
    return (v - mu) * jax.lax.rsqrt(var + eps) * gamma + beta


@functools.lru_cache(maxsize=None)
def _single_buffer_supported():
    """Feature probe: can constant-index operands be single-buffered via
    pipeline_mode=pl.Buffered(1)?  (Halves resident weight VMEM — matters on
    v7x's 64 MiB / v5e's 16 MiB scoped default.)"""
    try:
        def k(w_ref, o_ref):
            o_ref[...] = w_ref[...] + 1.0

        f = pl.pallas_call(
            k,
            out_shape=jax.ShapeDtypeStruct((8, 128), jnp.float32),
            grid=(2, 2),
            in_specs=[pl.BlockSpec((8, 128), lambda i, j: (0, 0),
                                   pipeline_mode=pl.Buffered(1))],
            out_specs=pl.BlockSpec((8, 128), lambda i, j: (0, 0)),
        )
        jax.jit(f).lower(jax.ShapeDtypeStruct((8, 128), jnp.float32)).compile()
        return True
    except Exception:
        return False


def _pick_q_tile(L, target):
    """Largest multiple-of-8 q tile <= target that divides L (or L itself)."""
    if L <= target:
        return L
    for cand in range(min(target, L), 7, -1):
        if cand % 8 == 0 and L % cand == 0:
            return cand
    return L


def _vmem_budget_bytes(L, D, H, d_ff, tq, single_buf, output_attention, has_final):
    """Rough VMEM budget for the fused layer kernel (drives vmem_limit_bytes)."""
    bf2, f4 = 2, 4
    dh_pad = max(D // H, 128)                      # lane padding of head scratch
    wbuf = 1 if single_buf else 2
    weights = wbuf * (4 * D * D + 2 * D * d_ff) * bf2
    small = wbuf * (3 * D + D + d_ff + D + 4 * D + (2 * D if has_final else 0)) * f4
    x_in = 2 * L * D * bf2                         # double-buffered x block
    out = 2 * tq * D * bf2
    attn = (2 * H * tq * L * bf2) if output_attention else 0
    scratch = 3 * H * L * dh_pad * bf2             # q/k/v head-leading scratch
    transient = (2 * H * tq * L + L * D + H * tq * D + tq * d_ff + 4 * tq * D) * f4
    return weights + small + x_in + out + attn + scratch + transient


# ----------------------------- fused layer kernel --------------------------- #

def _encoder_layer_kernel(*refs, n_heads, eps, tq, activation,
                          has_final_norm, output_attention):
    """One full EncoderLayer for one (batch element, q tile) grid step."""
    (x_ref,
     wq_ref, bq_ref, wk_ref, bk_ref, wv_ref, bv_ref,
     wo_ref, bo_ref,
     w1_ref, b1_ref, w2_ref, b2_ref,
     g1_ref, be1_ref, g2_ref, be2_ref) = refs[:17]
    idx = 17
    if has_final_norm:
        gf_ref, bf_ref = refs[idx:idx + 2]
        idx += 2
    o_ref = refs[idx]
    idx += 1
    if output_attention:
        attn_ref = refs[idx]
        idx += 1
    q_sc, k_sc, v_sc = refs[idx:idx + 3]           # (H, L, dh) bf16 scratch

    H = n_heads
    L, D = x_ref.shape[1], x_ref.shape[2]
    dh = D // H
    qi = pl.program_id(1)

    # ---- once per batch element: full-sequence Q/K/V projection, split into
    #      head-leading bf16 scratch (amortised over all q tiles; lane-aligned
    #      whenever dh is a multiple of 128) ----
    @pl.when(qi == 0)
    def _project_qkv():
        x_full = x_ref[0]                           # (L, D) bf16

        def project(w_ref, b_ref, dst):
            y = jnp.dot(x_full, w_ref[...],
                        preferred_element_type=jnp.float32) + b_ref[...]
            y = y.astype(jnp.bfloat16)
            for h in range(H):                      # trace-time loop, static slices
                dst[h] = y[:, h * dh:(h + 1) * dh]

        project(wq_ref, bq_ref, q_sc)               # 1/sqrt(dh) pre-folded in wq/bq
        project(wk_ref, bk_ref, k_sc)
        project(wv_ref, bv_ref, v_sc)

    row = pl.multiple_of(qi * tq, tq)

    # ---- attention for this q tile: one batched (over heads) matmul per stage ----
    q_t = q_sc[:, pl.ds(row, tq), :]                # (H, TQ, dh) bf16
    k = k_sc[...]                                   # (H, L, dh)  bf16
    v = v_sc[...]                                   # (H, L, dh)  bf16
    s = jnp.einsum('hqd,hkd->hqk', q_t, k,
                   preferred_element_type=jnp.float32)        # (H, TQ, L) f32
    s = s - jnp.max(s, axis=-1, keepdims=True)
    p = jnp.exp(s)
    p = p * pl.reciprocal(jnp.sum(p, axis=-1, keepdims=True), approx=True)
    if output_attention:
        attn_ref[0] = p.astype(attn_ref.dtype)
    pv = jnp.einsum('hqk,hkd->hqd', p.astype(jnp.bfloat16), v,
                    preferred_element_type=jnp.float32)       # (H, TQ, dh)

    # ---- output projection: wo pre-reshaped (H, dh, D); contiguous batched
    #      MXU matmuls + cheap head-sum (VPU) ----
    per_head = jnp.einsum('hqd,hdn->hqn', pv.astype(jnp.bfloat16), wo_ref[...],
                          preferred_element_type=jnp.float32)  # (H, TQ, D)
    new_x = jnp.sum(per_head, axis=0) + bo_ref[...]

    # ---- residual + LayerNorm1 (f32 math) ----
    x_t = x_ref[0, pl.ds(row, tq), :].astype(jnp.float32)      # (TQ, D)
    h1 = _layer_norm_f32(x_t + new_x, g1_ref[...], be1_ref[...], eps)

    # ---- FFN (Conv1d kernel_size=1 == Linear over channels) ----
    y = jnp.dot(h1.astype(jnp.bfloat16), w1_ref[...],
                preferred_element_type=jnp.float32) + b1_ref[...]
    if activation == "relu":
        y = jnp.maximum(y, 0.0)
    else:
        # TODO(synk): tanh-approx gelu (PyTorch F.gelu default is exact erf).
        y = jax.nn.gelu(y)
    y = jnp.dot(y.astype(jnp.bfloat16), w2_ref[...],
                preferred_element_type=jnp.float32) + b2_ref[...]

    # ---- residual + LayerNorm2 (+ fused final encoder norm on last layer) ----
    out = _layer_norm_f32(h1 + y, g2_ref[...], be2_ref[...], eps)
    if has_final_norm:
        out = _layer_norm_f32(out, gf_ref[...], bf_ref[...], eps)
    o_ref[0] = out.astype(o_ref.dtype)


def encoder_layer_fused(x, p, n_heads, final_norm=None, eps=1e-5,
                        output_attention=False, attn_dtype=jnp.bfloat16,
                        q_tile=256, activation="relu"):
    """One EncoderLayer (optionally + final encoder LayerNorm) in one pallas_call."""
    B, L, D = x.shape
    assert D % n_heads == 0
    dh = D // n_heads
    d_ff = p["w1"].shape[1]
    has_final = final_norm is not None

    # q-tile: 256 is a good default for v6e/v7x; pass q_tile=128 for v5e.
    tq = _pick_q_tile(L, q_tile)
    n_q = L // tq
    single_buf = _single_buffer_supported()

    def const_spec(shape):
        n = len(shape)
        if single_buf:
            return pl.BlockSpec(shape, lambda b, q, _n=n: (0,) * _n,
                                pipeline_mode=pl.Buffered(1))
        return pl.BlockSpec(shape, lambda b, q, _n=n: (0,) * _n)

    in_specs = [
        # x: block index constant over the q axis -> fetched once per batch elem.
        pl.BlockSpec((1, L, D), lambda b, q: (b, 0, 0)),
        const_spec((D, D)), const_spec((1, D)),            # wq, bq (pre-scaled)
        const_spec((D, D)), const_spec((1, D)),            # wk, bk
        const_spec((D, D)), const_spec((1, D)),            # wv, bv
        const_spec((n_heads, dh, D)), const_spec((1, D)),  # wo (H,dh,D), bo
        const_spec((D, d_ff)), const_spec((1, d_ff)),      # w1, b1
        const_spec((d_ff, D)), const_spec((1, D)),         # w2, b2
        const_spec((1, D)), const_spec((1, D)),            # g1, be1
        const_spec((1, D)), const_spec((1, D)),            # g2, be2
    ]
    args = [x, p["wq"], p["bq"], p["wk"], p["bk"], p["wv"], p["bv"],
            p["wo"], p["bo"], p["w1"], p["b1"], p["w2"], p["b2"],
            p["g1"], p["be1"], p["g2"], p["be2"]]
    if has_final:
        in_specs += [const_spec((1, D)), const_spec((1, D))]
        args += [final_norm["g"], final_norm["b"]]

    out_shapes = [jax.ShapeDtypeStruct((B, L, D), x.dtype)]
    out_specs = [pl.BlockSpec((1, tq, D), lambda b, q: (b, q, 0))]
    if output_attention:
        out_shapes.append(jax.ShapeDtypeStruct((B, n_heads, L, L), attn_dtype))
        out_specs.append(
            pl.BlockSpec((1, n_heads, tq, L), lambda b, q: (b, 0, q, 0)))

    kernel = functools.partial(
        _encoder_layer_kernel, n_heads=n_heads, eps=eps, tq=tq,
        activation=activation, has_final_norm=has_final,
        output_attention=output_attention)

    vmem_limit = _vmem_budget_bytes(L, D, n_heads, d_ff, tq, single_buf,
                                    output_attention, has_final)
    vmem_limit = int(min(max(vmem_limit + (4 << 20), 32 << 20), 128 << 20))

    outs = pl.pallas_call(
        kernel,
        out_shape=tuple(out_shapes),
        grid=(B, n_q),
        in_specs=in_specs,
        out_specs=tuple(out_specs),
        scratch_shapes=[
            pltpu.VMEM((n_heads, L, dh), jnp.bfloat16),   # Q (pre-scaled)
            pltpu.VMEM((n_heads, L, dh), jnp.bfloat16),   # K
            pltpu.VMEM((n_heads, L, dh), jnp.bfloat16),   # V
        ],
        compiler_params=pltpu.CompilerParams(
            # q axis is "arbitrary": K/V scratch is filled at qi==0 and reused.
            dimension_semantics=("parallel", "arbitrary"),
            vmem_limit_bytes=vmem_limit),
    )(*args)

    if output_attention:
        return outs[0], outs[1]
    (x_out,) = outs
    return x_out, None


# --------------------------- Encoder (forward) ----------------------------- #

def init_encoder_params(key, n_layers, d_model, n_heads, d_ff,
                        weight_dtype=jnp.bfloat16):
    """Linear weights in bf16 (MXU-native); biases/LN params f32.
    1/sqrt(dh) is folded into wq/bq; wo is stored head-leading (H, dh, D)."""
    dh = d_model // n_heads
    scale = 1.0 / math.sqrt(dh)
    params = []

    def dense(k, shape, s=1.0):
        return (jax.random.normal(k, shape, jnp.float32) * 0.05 * s).astype(weight_dtype)

    for _ in range(n_layers):
        keys = jax.random.split(key, 7)
        key = keys[0]
        wo = dense(keys[5], (d_model, d_model))
        layer = dict(
            wq=dense(keys[1], (d_model, d_model), scale),
            bq=jnp.zeros((1, d_model), jnp.float32),        # (pre-scaled; zero here)
            wk=dense(keys[2], (d_model, d_model)),
            bk=jnp.zeros((1, d_model), jnp.float32),
            wv=dense(keys[3], (d_model, d_model)),
            bv=jnp.zeros((1, d_model), jnp.float32),
            wo=wo.reshape(n_heads, dh, d_model),            # == concat-heads @ Wo
            bo=jnp.zeros((1, d_model), jnp.float32),
            w1=dense(keys[4], (d_model, d_ff)),
            b1=jnp.zeros((1, d_ff), jnp.float32),
            w2=dense(keys[6], (d_ff, d_model)),
            b2=jnp.zeros((1, d_model), jnp.float32),
            g1=jnp.ones((1, d_model), jnp.float32),
            be1=jnp.zeros((1, d_model), jnp.float32),
            g2=jnp.ones((1, d_model), jnp.float32),
            be2=jnp.zeros((1, d_model), jnp.float32),
        )
        params.append(layer)
    norm = dict(g=jnp.ones((1, d_model), jnp.float32),
                b=jnp.zeros((1, d_model), jnp.float32))
    return params, norm


def encoder_forward(x, layer_params, norm_params, n_heads, attn_mask=None,
                    output_attention=False, q_tile=256, activation="relu"):
    """Encoder.forward (conv_layers=None path): stacked attn layers + final norm."""
    if attn_mask is not None:
        # TODO(synk): attention masking not implemented (reference path is mask=None).
        raise NotImplementedError("attn_mask is not supported by this Pallas Encoder")
    out_dtype = x.dtype
    # Inter-layer activations stay bf16 at the pallas_call boundary; LN/softmax
    # math is f32 inside the kernel.
    x = x.astype(jnp.bfloat16)
    attns = []
    n = len(layer_params)
    for i, lp in enumerate(layer_params):
        # Fuse the final encoder LayerNorm into the last layer's kernel.
        fused_final = norm_params if (i == n - 1 and norm_params is not None) else None
        x, attn = encoder_layer_fused(
            x, lp, n_heads, final_norm=fused_final,
            output_attention=output_attention, q_tile=q_tile,
            activation=activation)
        attns.append(attn)
    return x.astype(out_dtype), attns


# --------------------------------- main ------------------------------------ #

if __name__ == "__main__":
    B, L, D = 2, 8, 32
    n_heads, d_ff, n_layers = 4, 64, 2

    key = jax.random.PRNGKey(0)
    key_x, key_p = jax.random.split(key)
    x = jax.random.normal(key_x, (B, L, D), jnp.float32)

    layer_params, norm_params = init_encoder_params(key_p, n_layers, D, n_heads, d_ff)

    _single_buffer_supported()   # run the feature probe eagerly (cached)

    # Default path: attention probabilities are not materialised (saves the
    # O(L^2) HBM writeback and its double-buffered VMEM block).
    fwd = jax.jit(functools.partial(encoder_forward, n_heads=n_heads))
    out, attns = fwd(x, layer_params, norm_params)
    out = jax.block_until_ready(out)
    assert out.shape == (B, L, D) and out.dtype == x.dtype
    assert all(a is None for a in attns)
    assert bool(jnp.isfinite(out).all())

    # Optional path: attention probabilities requested explicitly.
    fwd_attn = jax.jit(functools.partial(encoder_forward, n_heads=n_heads,
                                         output_attention=True))
    out2, attns2 = fwd_attn(x, layer_params, norm_params)
    out2 = jax.block_until_ready(out2)
    for a in attns2:
        jax.block_until_ready(a)
    assert len(attns2) == n_layers and attns2[0].shape == (B, n_heads, L, L)
    assert bool(jnp.isfinite(out2).all())

    print("KERNEL_OK")
</pallas_src>

<mosaic_0001>
module attributes {stable_mosaic.version = 11 : i64} {
  func.func @_encoder_layer_kernel(%arg0: i32, %arg1: i32, %arg2: memref<1x8x32xbf16, #tpu.memory_space<vmem>>, %arg3: memref<32x32xbf16, #tpu.memory_space<vmem>>, %arg4: memref<1x32xf32, #tpu.memory_space<vmem>>, %arg5: memref<32x32xbf16, #tpu.memory_space<vmem>>, %arg6: memref<1x32xf32, #tpu.memory_space<vmem>>, %arg7: memref<32x32xbf16, #tpu.memory_space<vmem>>, %arg8: memref<1x32xf32, #tpu.memory_space<vmem>>, %arg9: memref<4x8x32xbf16, #tpu.memory_space<vmem>>, %arg10: memref<1x32xf32, #tpu.memory_space<vmem>>, %arg11: memref<32x64xbf16, #tpu.memory_space<vmem>>, %arg12: memref<1x64xf32, #tpu.memory_space<vmem>>, %arg13: memref<64x32xbf16, #tpu.memory_space<vmem>>, %arg14: memref<1x32xf32, #tpu.memory_space<vmem>>, %arg15: memref<1x32xf32, #tpu.memory_space<vmem>>, %arg16: memref<1x32xf32, #tpu.memory_space<vmem>>, %arg17: memref<1x32xf32, #tpu.memory_space<vmem>>, %arg18: memref<1x32xf32, #tpu.memory_space<vmem>>, %arg19: memref<1x32xf32, #tpu.memory_space<vmem>>, %arg20: memref<1x32xf32, #tpu.memory_space<vmem>>, %arg21: memref<1x8x32xbf16, #tpu.memory_space<vmem>>, %arg22: memref<4x8x8xbf16, #tpu.memory_space<vmem>>, %arg23: memref<4x8x8xbf16, #tpu.memory_space<vmem>>, %arg24: memref<4x8x8xbf16, #tpu.memory_space<vmem>>) attributes {dimension_semantics = [#tpu.dimension_semantics<parallel>, #tpu.dimension_semantics<arbitrary>], iteration_bounds = array<i64: 2, 1>, scalar_prefetch = 0 : i64, scratch_operands = 3 : i64, tpu.core_type = #tpu.core_type<tc>, window_params = [{transform_indices = @transform_0, window_bounds = array<i64: 1, 8, 32>}, {pipeline_mode = #tpu.pipeline_mode<synchronous>, transform_indices = @transform_1, window_bounds = array<i64: 32, 32>}, {pipeline_mode = #tpu.pipeline_mode<synchronous>, transform_indices = @transform_2, window_bounds = array<i64: 1, 32>}, {pipeline_mode = #tpu.pipeline_mode<synchronous>, transform_indices = @transform_3, window_bounds = array<i64: 32, 32>}, {pipeline_mode = #tpu.pipeline_mode<synchronous>, transform_indices = @transform_4, window_bounds = array<i64: 1, 32>}, {pipeline_mode = #tpu.pipeline_mode<synchronous>, transform_indices = @transform_5, window_bounds = array<i64: 32, 32>}, {pipeline_mode = #tpu.pipeline_mode<synchronous>, transform_indices = @transform_6, window_bounds = array<i64: 1, 32>}, {pipeline_mode = #tpu.pipeline_mode<synchronous>, transform_indices = @transform_7, window_bounds = array<i64: 4, 8, 32>}, {pipeline_mode = #tpu.pipeline_mode<synchronous>, transform_indices = @transform_8, window_bounds = array<i64: 1, 32>}, {pipeline_mode = #tpu.pipeline_mode<synchronous>, transform_indices = @transform_9, window_bounds = array<i64: 32, 64>}, {pipeline_mode = #tpu.pipeline_mode<synchronous>, transform_indices = @transform_10, window_bounds = array<i64: 1, 64>}, {pipeline_mode = #tpu.pipeline_mode<synchronous>, transform_indices = @transform_11, window_bounds = array<i64: 64, 32>}, {pipeline_mode = #tpu.pipeline_mode<synchronous>, transform_indices = @transform_12, window_bounds = array<i64: 1, 32>}, {pipeline_mode = #tpu.pipeline_mode<synchronous>, transform_indices = @transform_13, window_bounds = array<i64: 1, 32>}, {pipeline_mode = #tpu.pipeline_mode<synchronous>, transform_indices = @transform_14, window_bounds = array<i64: 1, 32>}, {pipeline_mode = #tpu.pipeline_mode<synchronous>, transform_indices = @transform_15, window_bounds = array<i64: 1, 32>}, {pipeline_mode = #tpu.pipeline_mode<synchronous>, transform_indices = @transform_16, window_bounds = array<i64: 1, 32>}, {pipeline_mode = #tpu.pipeline_mode<synchronous>, transform_indices = @transform_17, window_bounds = array<i64: 1, 32>}, {pipeline_mode = #tpu.pipeline_mode<synchronous>, transform_indices = @transform_18, window_bounds = array<i64: 1, 32>}, {transform_indices = @transform_19, window_bounds = array<i64: 1, 8, 32>}]} {
    %c0_i32 = arith.constant 0 : i32
    %0 = arith.cmpi eq, %arg1, %c0_i32 : i32
    %1 = arith.extui %0 : i1 to i32
    %c0_i32_0 = arith.constant 0 : i32
    %2 = arith.cmpi ne, %1, %c0_i32_0 : i32
    scf.if %2 {
      %c0_61 = arith.constant 0 : index
      %c0_62 = arith.constant 0 : index
      %c0_63 = arith.constant 0 : index
      %125 = vector.load %arg2[%c0_61, %c0_62, %c0_63] : memref<1x8x32xbf16, #tpu.memory_space<vmem>>, vector<1x8x32xbf16>
      %126 = vector.shape_cast %125 : vector<1x8x32xbf16> to vector<8x32xbf16>
      %c0_64 = arith.constant 0 : index
      %c0_65 = arith.constant 0 : index
      %127 = vector.load %arg3[%c0_64, %c0_65] : memref<32x32xbf16, #tpu.memory_space<vmem>>, vector<32x32xbf16>
      %cst_66 = arith.constant dense<0.000000e+00> : vector<8x32xf32>
      %128 = tpu.matmul %126, %127, %cst_66 {dimension_numbers = #tpu.dot_dimension_numbers<[1], [0], [0], [1], [0, 0, 1, 1], [], []>} : vector<8x32xbf16>, vector<32x32xbf16>, vector<8x32xf32> -> vector<8x32xf32>
      %c0_67 = arith.constant 0 : index
      %c0_68 = arith.constant 0 : index
      %129 = vector.load %arg4[%c0_67, %c0_68] : memref<1x32xf32, #tpu.memory_space<vmem>>, vector<1x32xf32>
      %130 = vector.broadcast %129 : vector<1x32xf32> to vector<8x32xf32>
      %131 = arith.addf %128, %130 : vector<8x32xf32>
      %132 = arith.truncf %131 : vector<8x32xf32> to vector<8x32xbf16>
      %133 = vector.extract_strided_slice %132 {offsets = [0, 0], sizes = [8, 8], strides = [1, 1]} : vector<8x32xbf16> to vector<8x8xbf16>
      %c0_69 = arith.constant 0 : index
      %c0_70 = arith.constant 0 : index
      %c0_71 = arith.constant 0 : index
      %134 = vector.load %arg22[%c0_69, %c0_70, %c0_71] : memref<4x8x8xbf16, #tpu.memory_space<vmem>>, vector<1x8x8xbf16>
      %135 = vector.shape_cast %134 : vector<1x8x8xbf16> to vector<8x8xbf16>
      %136 = vector.shape_cast %133 : vector<8x8xbf16> to vector<1x8x8xbf16>
      tpu.vector_store %arg22[%c0_69, %c0_70, %c0_71], %136 {strides = array<i32>} : memref<4x8x8xbf16, #tpu.memory_space<vmem>>, vector<1x8x8xbf16>,
      %137 = vector.extract_strided_slice %132 {offsets = [0, 8], sizes = [8, 8], strides = [1, 1]} : vector<8x32xbf16> to vector<8x8xbf16>
      %c1 = arith.constant 1 : index
      %c0_72 = arith.constant 0 : index
      %c0_73 = arith.constant 0 : index
      %138 = vector.load %arg22[%c1, %c0_72, %c0_73] : memref<4x8x8xbf16, #tpu.memory_space<vmem>>, vector<1x8x8xbf16>
      %139 = vector.shape_cast %138 : vector<1x8x8xbf16> to vector<8x8xbf16>
      %140 = vector.shape_cast %137 : vector<8x8xbf16> to vector<1x8x8xbf16>
      tpu.vector_store %arg22[%c1, %c0_72, %c0_73], %140 {strides = array<i32>} : memref<4x8x8xbf16, #tpu.memory_space<vmem>>, vector<1x8x8xbf16>,
      %141 = vector.extract_strided_slice %132 {offsets = [0, 16], sizes = [8, 8], strides = [1, 1]} : vector<8x32xbf16> to vector<8x8xbf16>
      %c2 = arith.constant 2 : index
      %c0_74 = arith.constant 0 : index
      %c0_75 = arith.constant 0 : index
      %142 = vector.load %arg22[%c2, %c0_74, %c0_75] : memref<4x8x8xbf16, #tpu.memory_space<vmem>>, vector<1x8x8xbf16>
      %143 = vector.shape_cast %142 : vector<1x8x8xbf16> to vector<8x8xbf16>
      %144 = vector.shape_cast %141 : vector<8x8xbf16> to vector<1x8x8xbf16>
      tpu.vector_store %arg22[%c2, %c0_74, %c0_75], %144 {strides = array<i32>} : memref<4x8x8xbf16, #tpu.memory_space<vmem>>, vector<1x8x8xbf16>,
      %145 = vector.extract_strided_slice %132 {offsets = [0, 24], sizes = [8, 8], strides = [1, 1]} : vector<8x32xbf16> to vector<8x8xbf16>
      %c3 = arith.constant 3 : index
      %c0_76 = arith.constant 0 : index
      %c0_77 = arith.constant 0 : index
      %146 = vector.load %arg22[%c3, %c0_76, %c0_77] : memref<4x8x8xbf16, #tpu.memory_space<vmem>>, vector<1x8x8xbf16>
      %147 = vector.shape_cast %146 : vector<1x8x8xbf16> to vector<8x8xbf16>
      %148 = vector.shape_cast %145 : vector<8x8xbf16> to vector<1x8x8xbf16>
      tpu.vector_store %arg22[%c3, %c0_76, %c0_77], %148 {strides = array<i32>} : memref<4x8x8xbf16, #tpu.memory_space<vmem>>, vector<1x8x8xbf16>,
      %c0_78 = arith.constant 0 : index
      %c0_79 = arith.constant 0 : index
      %149 = vector.load %arg5[%c0_78, %c0_79] : memref<32x32xbf16, #tpu.memory_space<vmem>>, vector<32x32xbf16>
      %cst_80 = arith.constant dense<0.000000e+00> : vector<8x32xf32>
      %150 = tpu.matmul %126, %149, %cst_80 {dimension_numbers = #tpu.dot_dimension_numbers<[1], [0], [0], [1], [0, 0, 1, 1], [], []>} : vector<8x32xbf16>, vector<32x32xbf16>, vector<8x32xf32> -> vector<8x32xf32>
      %c0_81 = arith.constant 0 : index
      %c0_82 = arith.constant 0 : index
      %151 = vector.load %arg6[%c0_81, %c0_82] : memref<1x32xf32, #tpu.memory_space<vmem>>, vector<1x32xf32>
      %152 = vector.broadcast %151 : vector<1x32xf32> to vector<8x32xf32>
      %153 = arith.addf %150, %152 : vector<8x32xf32>
      %154 = arith.truncf %153 : vector<8x32xf32> to vector<8x32xbf16>
      %155 = vector.extract_strided_slice %154 {offsets = [0, 0], sizes = [8, 8], strides = [1, 1]} : vector<8x32xbf16> to vector<8x8xbf16>
      %c0_83 = arith.constant 0 : index
      %c0_84 = arith.constant 0 : index
      %c0_85 = arith.constant 0 : index
      %156 = vector.load %arg23[%c0_83, %c0_84, %c0_85] : memref<4x8x8xbf16, #tpu.memory_space<vmem>>, vector<1x8x8xbf16>
      %157 = vector.shape_cast %156 : vector<1x8x8xbf16> to vector<8x8xbf16>
      %158 = vector.shape_cast %155 : vector<8x8xbf16> to vector<1x8x8xbf16>
      tpu.vector_store %arg23[%c0_83, %c0_84, %c0_85], %158 {strides = array<i32>} : memref<4x8x8xbf16, #tpu.memory_space<vmem>>, vector<1x8x8xbf16>,
      %159 = vector.extract_strided_slice %154 {offsets = [0, 8], sizes = [8, 8], strides = [1, 1]} : vector<8x32xbf16> to vector<8x8xbf16>
      %c1_86 = arith.constant 1 : index
      %c0_87 = arith.constant 0 : index
      %c0_88 = arith.constant 0 : index
      %160 = vector.load %arg23[%c1_86, %c0_87, %c0_88] : memref<4x8x8xbf16, #tpu.memory_space<vmem>>, vector<1x8x8xbf16>
      %161 = vector.shape_cast %160 : vector<1x8x8xbf16> to vector<8x8xbf16>
      %162 = vector.shape_cast %159 : vector<8x8xbf16> to vector<1x8x8xbf16>
      tpu.vector_store %arg23[%c1_86, %c0_87, %c0_88], %162 {strides = array<i32>} : memref<4x8x8xbf16, #tpu.memory_space<vmem>>, vector<1x8x8xbf16>,
      %163 = vector.extract_strided_slice %154 {offsets = [0, 16], sizes = [8, 8], strides = [1, 1]} : vector<8x32xbf16> to vector<8x8xbf16>
      %c2_89 = arith.constant 2 : index
      %c0_90 = arith.constant 0 : index
      %c0_91 = arith.constant 0 : index
      %164 = vector.load %arg23[%c2_89, %c0_90, %c0_91] : memref<4x8x8xbf16, #tpu.memory_space<vmem>>, vector<1x8x8xbf16>
      %165 = vector.shape_cast %164 : vector<1x8x8xbf16> to vector<8x8xbf16>
      %166 = vector.shape_cast %163 : vector<8x8xbf16> to vector<1x8x8xbf16>
      tpu.vector_store %arg23[%c2_89, %c0_90, %c0_91], %166 {strides = array<i32>} : memref<4x8x8xbf16, #tpu.memory_space<vmem>>, vector<1x8x8xbf16>,
      %167 = vector.extract_strided_slice %154 {offsets = [0, 24], sizes = [8, 8], strides = [1, 1]} : vector<8x32xbf16> to vector<8x8xbf16>
      %c3_92 = arith.constant 3 : index
      %c0_93 = arith.constant 0 : index
      %c0_94 = arith.constant 0 : index
      %168 = vector.load %arg23[%c3_92, %c0_93, %c0_94] : memref<4x8x8xbf16, #tpu.memory_space<vmem>>, vector<1x8x8xbf16>
      %169 = vector.shape_cast %168 : vector<1x8x8xbf16> to vector<8x8xbf16>
      %170 = vector.shape_cast %167 : vector<8x8xbf16> to vector<1x8x8xbf16>
      tpu.vector_store %arg23[%c3_92, %c0_93, %c0_94], %170 {strides = array<i32>} : memref<4x8x8xbf16, #tpu.memory_space<vmem>>, vector<1x8x8xbf16>,
      %c0_95 = arith.constant 0 : index
      %c0_96 = arith.constant 0 : index
      %171 = vector.load %arg7[%c0_95, %c0_96] : memref<32x32xbf16, #tpu.memory_space<vmem>>, vector<32x32xbf16>
      %cst_97 = arith.constant dense<0.000000e+00> : vector<8x32xf32>
      %172 = tpu.matmul %126, %171, %cst_97 {dimension_numbers = #tpu.dot_dimension_numbers<[1], [0], [0], [1], [0, 0, 1, 1], [], []>} : vector<8x32xbf16>, vector<32x32xbf16>, vector<8x32xf32> -> vector<8x32xf32>
      %c0_98 = arith.constant 0 : index
      %c0_99 = arith.constant 0 : index
      %173 = vector.load %arg8[%c0_98, %c0_99] : memref<1x32xf32, #tpu.memory_space<vmem>>, vector<1x32xf32>
      %174 = vector.broadcast %173 : vector<1x32xf32> to vector<8x32xf32>
      %175 = arith.addf %172, %174 : vector<8x32xf32>
      %176 = arith.truncf %175 : vector<8x32xf32> to vector<8x32xbf16>
      %177 = vector.extract_strided_slice %176 {offsets = [0, 0], sizes = [8, 8], strides = [1, 1]} : vector<8x32xbf16> to vector<8x8xbf16>
      %c0_100 = arith.constant 0 : index
      %c0_101 = arith.constant 0 : index
      %c0_102 = arith.constant 0 : index
      %178 = vector.load %arg24[%c0_100, %c0_101, %c0_102] : memref<4x8x8xbf16, #tpu.memory_space<vmem>>, vector<1x8x8xbf16>
      %179 = vector.shape_cast %178 : vector<1x8x8xbf16> to vector<8x8xbf16>
      %180 = vector.shape_cast %177 : vector<8x8xbf16> to vector<1x8x8xbf16>
      tpu.vector_store %arg24[%c0_100, %c0_101, %c0_102], %180 {strides = array<i32>} : memref<4x8x8xbf16, #tpu.memory_space<vmem>>, vector<1x8x8xbf16>,
      %181 = vector.extract_strided_slice %176 {offsets = [0, 8], sizes = [8, 8], strides = [1, 1]} : vector<8x32xbf16> to vector<8x8xbf16>
      %c1_103 = arith.constant 1 : index
      %c0_104 = arith.constant 0 : index
      %c0_105 = arith.constant 0 : index
      %182 = vector.load %arg24[%c1_103, %c0_104, %c0_105] : memref<4x8x8xbf16, #tpu.memory_space<vmem>>, vector<1x8x8xbf16>
      %183 = vector.shape_cast %182 : vector<1x8x8xbf16> to vector<8x8xbf16>
      %184 = vector.shape_cast %181 : vector<8x8xbf16> to vector<1x8x8xbf16>
      tpu.vector_store %arg24[%c1_103, %c0_104, %c0_105], %184 {strides = array<i32>} : memref<4x8x8xbf16, #tpu.memory_space<vmem>>, vector<1x8x8xbf16>,
      %185 = vector.extract_strided_slice %176 {offsets = [0, 16], sizes = [8, 8], strides = [1, 1]} : vector<8x32xbf16> to vector<8x8xbf16>
      %c2_106 = arith.constant 2 : index
      %c0_107 = arith.constant 0 : index
      %c0_108 = arith.constant 0 : index
      %186 = vector.load %arg24[%c2_106, %c0_107, %c0_108] : memref<4x8x8xbf16, #tpu.memory_space<vmem>>, vector<1x8x8xbf16>
      %187 = vector.shape_cast %186 : vector<1x8x8xbf16> to vector<8x8xbf16>
      %188 = vector.shape_cast %185 : vector<8x8xbf16> to vector<1x8x8xbf16>
      tpu.vector_store %arg24[%c2_106, %c0_107, %c0_108], %188 {strides = array<i32>} : memref<4x8x8xbf16, #tpu.memory_space<vmem>>, vector<1x8x8xbf16>,
      %189 = vector.extract_strided_slice %176 {offsets = [0, 24], sizes = [8, 8], strides = [1, 1]} : vector<8x32xbf16> to vector<8x8xbf16>
      %c3_109 = arith.constant 3 : index
      %c0_110 = arith.constant 0 : index
      %c0_111 = arith.constant 0 : index
      %190 = vector.load %arg24[%c3_109, %c0_110, %c0_111] : memref<4x8x8xbf16, #tpu.memory_space<vmem>>, vector<1x8x8xbf16>
      %191 = vector.shape_cast %190 : vector<1x8x8xbf16> to vector<8x8xbf16>
      %192 = vector.shape_cast %189 : vector<8x8xbf16> to vector<1x8x8xbf16>
      tpu.vector_store %arg24[%c3_109, %c0_110, %c0_111], %192 {strides = array<i32>} : memref<4x8x8xbf16, #tpu.memory_space<vmem>>, vector<1x8x8xbf16>,
    } else {
    }
    %c8_i32 = arith.constant 8 : i32
    %3 = arith.muli %arg1, %c8_i32 : i32
    %4 = tpu.assume_multiple %3, 8 : i32
    %c0 = arith.constant 0 : index
    %5 = arith.index_cast %4 : i32 to index
    %c0_1 = arith.constant 0 : index
    %6 = vector.load %arg22[%c0, %5, %c0_1] : memref<4x8x8xbf16, #tpu.memory_space<vmem>>, vector<4x8x8xbf16>
    %c0_2 = arith.constant 0 : index
    %c0_3 = arith.constant 0 : index
    %c0_4 = arith.constant 0 : index
    %7 = vector.load %arg23[%c0_2, %c0_3, %c0_4] : memref<4x8x8xbf16, #tpu.memory_space<vmem>>, vector<4x8x8xbf16>
    %c0_5 = arith.constant 0 : index
    %c0_6 = arith.constant 0 : index
    %c0_7 = arith.constant 0 : index
    %8 = vector.load %arg24[%c0_5, %c0_6, %c0_7] : memref<4x8x8xbf16, #tpu.memory_space<vmem>>, vector<4x8x8xbf16>
    "tpu.trace_start"() <{level = 10 : i32, message = "hqd,hkd->hqk"}> : () -> ()
    %cst = arith.constant dense<0.000000e+00> : vector<4x8x8xf32>
    %9 = tpu.matmul %6, %7, %cst {dimension_numbers = #tpu.dot_dimension_numbers<[2], [2], [1], [1], [0, 0, 0, 1, 1, 1], [0], [0]>} : vector<4x8x8xbf16>, vector<4x8x8xbf16>, vector<4x8x8xf32> -> vector<4x8x8xf32>
    "tpu.trace_stop"() : () -> ()
    %cst_8 = arith.constant dense<0xFF800000> : vector<4x8xf32>
    %10 = vector.multi_reduction <maximumf>, %9, %cst_8 [2] : vector<4x8x8xf32> to vector<4x8xf32>
    %11 = vector.shape_cast %10 : vector<4x8xf32> to vector<4x8x1xf32>
    %12 = vector.broadcast %11 : vector<4x8x1xf32> to vector<4x8x8xf32>
    %13 = arith.subf %9, %12 : vector<4x8x8xf32>
    %14 = math.exp %13 : vector<4x8x8xf32>
    %cst_9 = arith.constant dense<0.000000e+00> : vector<4x8xf32>
    %15 = vector.multi_reduction <add>, %14, %cst_9 [2] : vector<4x8x8xf32> to vector<4x8xf32>
    %16 = vector.shape_cast %15 : vector<4x8xf32> to vector<4x8x1xf32>
    %17 = tpu.reciprocal %16 {approx = true} : vector<4x8x1xf32> -> vector<4x8x1xf32>
    %18 = vector.broadcast %17 : vector<4x8x1xf32> to vector<4x8x8xf32>
    %19 = arith.mulf %14, %18 : vector<4x8x8xf32>
    %20 = arith.truncf %19 : vector<4x8x8xf32> to vector<4x8x8xbf16>
    "tpu.trace_start"() <{level = 10 : i32, message = "hqk,hkd->hqd"}> : () -> ()
    %cst_10 = arith.constant dense<0.000000e+00> : vector<4x8x8xf32>
    %21 = tpu.matmul %20, %8, %cst_10 {dimension_numbers = #tpu.dot_dimension_numbers<[2], [1], [1], [2], [0, 0, 0, 1, 1, 2], [0], [0]>} : vector<4x8x8xbf16>, vector<4x8x8xbf16>, vector<4x8x8xf32> -> vector<4x8x8xf32>
    "tpu.trace_stop"() : () -> ()
    %22 = arith.truncf %21 : vector<4x8x8xf32> to vector<4x8x8xbf16>
    %c0_11 = arith.constant 0 : index
    %c0_12 = arith.constant 0 : index
    %c0_13 = arith.constant 0 : index
    %23 = vector.load %arg9[%c0_11, %c0_12, %c0_13] : memref<4x8x32xbf16, #tpu.memory_space<vmem>>, vector<4x8x32xbf16>
    "tpu.trace_start"() <{level = 10 : i32, message = "hqd,hdn->hqn"}> : () -> ()
    %cst_14 = arith.constant dense<0.000000e+00> : vector<4x8x32xf32>
    %24 = tpu.matmul %22, %23, %cst_14 {dimension_numbers = #tpu.dot_dimension_numbers<[2], [1], [1], [2], [0, 0, 0, 1, 1, 2], [0], [0]>} : vector<4x8x8xbf16>, vector<4x8x32xbf16>, vector<4x8x32xf32> -> vector<4x8x32xf32>
    "tpu.trace_stop"() : () -> ()
    %cst_15 = arith.constant dense<0.000000e+00> : vector<8x32xf32>
    %25 = vector.multi_reduction <add>, %24, %cst_15 [0] : vector<4x8x32xf32> to vector<8x32xf32>
    %c0_16 = arith.constant 0 : index
    %c0_17 = arith.constant 0 : index
    %26 = vector.load %arg10[%c0_16, %c0_17] : memref<1x32xf32, #tpu.memory_space<vmem>>, vector<1x32xf32>
    %27 = vector.broadcast %26 : vector<1x32xf32> to vector<8x32xf32>
    %28 = arith.addf %25, %27 : vector<8x32xf32>
    %c0_18 = arith.constant 0 : index
    %29 = arith.index_cast %4 : i32 to index
    %c0_19 = arith.constant 0 : index
    %30 = vector.load %arg2[%c0_18, %29, %c0_19] : memref<1x8x32xbf16, #tpu.memory_space<vmem>>, vector<1x8x32xbf16>
    %31 = vector.shape_cast %30 : vector<1x8x32xbf16> to vector<8x32xbf16>
    %32 = arith.extf %31 : vector<8x32xbf16> to vector<8x32xf32>
    %33 = arith.addf %32, %28 : vector<8x32xf32>
    %c0_20 = arith.constant 0 : index
    %c0_21 = arith.constant 0 : index
    %34 = vector.load %arg15[%c0_20, %c0_21] : memref<1x32xf32, #tpu.memory_space<vmem>>, vector<1x32xf32>
    %c0_22 = arith.constant 0 : index
    %c0_23 = arith.constant 0 : index
    %35 = vector.load %arg16[%c0_22, %c0_23] : memref<1x32xf32, #tpu.memory_space<vmem>>, vector<1x32xf32>
    %cst_24 = arith.constant dense<0.000000e+00> : vector<8xf32>
    %36 = vector.multi_reduction <add>, %33, %cst_24 [1] : vector<8x32xf32> to vector<8xf32>
    %37 = vector.shape_cast %36 : vector<8xf32> to vector<8x1xf32>
    %cst_25 = arith.constant 3.200000e+01 : f32
    %38 = vector.broadcast %cst_25 : f32 to vector<8x1xf32>
    %39 = arith.divf %37, %38 : vector<8x1xf32>
    %40 = vector.broadcast %39 : vector<8x1xf32> to vector<8x32xf32>
    %41 = arith.subf %33, %40 : vector<8x32xf32>
    %42 = arith.mulf %41, %41 : vector<8x32xf32>
    %cst_26 = arith.constant dense<0.000000e+00> : vector<8xf32>
    %43 = vector.multi_reduction <add>, %42, %cst_26 [1] : vector<8x32xf32> to vector<8xf32>
    %44 = vector.shape_cast %43 : vector<8xf32> to vector<8x1xf32>
    %cst_27 = arith.constant 3.200000e+01 : f32
    %45 = vector.broadcast %cst_27 : f32 to vector<8x1xf32>
    %46 = arith.divf %44, %45 : vector<8x1xf32>
    %47 = vector.broadcast %39 : vector<8x1xf32> to vector<8x32xf32>
    %48 = arith.subf %33, %47 : vector<8x32xf32>
    %cst_28 = arith.constant 9.99999974E-6 : f32
    %49 = vector.broadcast %cst_28 : f32 to vector<8x1xf32>
    %50 = arith.addf %46, %49 : vector<8x1xf32>
    %51 = math.rsqrt %50 : vector<8x1xf32>
    %52 = vector.broadcast %51 : vector<8x1xf32> to vector<8x32xf32>
    %53 = arith.mulf %48, %52 : vector<8x32xf32>
    %54 = vector.broadcast %34 : vector<1x32xf32> to vector<8x32xf32>
    %55 = arith.mulf %53, %54 : vector<8x32xf32>
    %56 = vector.broadcast %35 : vector<1x32xf32> to vector<8x32xf32>
    %57 = arith.addf %55, %56 : vector<8x32xf32>
    %58 = arith.truncf %57 : vector<8x32xf32> to vector<8x32xbf16>
    %c0_29 = arith.constant 0 : index
    %c0_30 = arith.constant 0 : index
    %59 = vector.load %arg11[%c0_29, %c0_30] : memref<32x64xbf16, #tpu.memory_space<vmem>>, vector<32x64xbf16>
    %cst_31 = arith.constant dense<0.000000e+00> : vector<8x64xf32>
    %60 = tpu.matmul %58, %59, %cst_31 {dimension_numbers = #tpu.dot_dimension_numbers<[1], [0], [0], [1], [0, 0, 1, 1], [], []>} : vector<8x32xbf16>, vector<32x64xbf16>, vector<8x64xf32> -> vector<8x64xf32>
    %c0_32 = arith.constant 0 : index
    %c0_33 = arith.constant 0 : index
    %61 = vector.load %arg12[%c0_32, %c0_33] : memref<1x64xf32, #tpu.memory_space<vmem>>, vector<1x64xf32>
    %62 = vector.broadcast %61 : vector<1x64xf32> to vector<8x64xf32>
    %63 = arith.addf %60, %62 : vector<8x64xf32>
    %cst_34 = arith.constant 0.000000e+00 : f32
    %64 = vector.broadcast %cst_34 : f32 to vector<8x64xf32>
    %65 = arith.maximumf %63, %64 : vector<8x64xf32>
    %66 = arith.truncf %65 : vector<8x64xf32> to vector<8x64xbf16>
    %c0_35 = arith.constant 0 : index
    %c0_36 = arith.constant 0 : index
    %67 = vector.load %arg13[%c0_35, %c0_36] : memref<64x32xbf16, #tpu.memory_space<vmem>>, vector<64x32xbf16>
    %cst_37 = arith.constant dense<0.000000e+00> : vector<8x32xf32>
    %68 = tpu.matmul %66, %67, %cst_37 {dimension_numbers = #tpu.dot_dimension_numbers<[1], [0], [0], [1], [0, 0, 1, 1], [], []>} : vector<8x64xbf16>, vector<64x32xbf16>, vector<8x32xf32> -> vector<8x32xf32>
    %c0_38 = arith.constant 0 : index
    %c0_39 = arith.constant 0 : index
    %69 = vector.load %arg14[%c0_38, %c0_39] : memref<1x32xf32, #tpu.memory_space<vmem>>, vector<1x32xf32>
    %70 = vector.broadcast %69 : vector<1x32xf32> to vector<8x32xf32>
    %71 = arith.addf %68, %70 : vector<8x32xf32>
    %72 = arith.addf %57, %71 : vector<8x32xf32>
    %c0_40 = arith.constant 0 : index
    %c0_41 = arith.constant 0 : index
    %73 = vector.load %arg17[%c0_40, %c0_41] : memref<1x32xf32, #tpu.memory_space<vmem>>, vector<1x32xf32>
    %c0_42 = arith.constant 0 : index
    %c0_43 = arith.constant 0 : index
    %74 = vector.load %arg18[%c0_42, %c0_43] : memref<1x32xf32, #tpu.memory_space<vmem>>, vector<1x32xf32>
    %cst_44 = arith.constant dense<0.000000e+00> : vector<8xf32>
    %75 = vector.multi_reduction <add>, %72, %cst_44 [1] : vector<8x32xf32> to vector<8xf32>
    %76 = vector.shape_cast %75 : vector<8xf32> to vector<8x1xf32>
    %cst_45 = arith.constant 3.200000e+01 : f32
    %77 = vector.broadcast %cst_45 : f32 to vector<8x1xf32>
    %78 = arith.divf %76, %77 : vector<8x1xf32>
    %79 = vector.broadcast %78 : vector<8x1xf32> to vector<8x32xf32>
    %80 = arith.subf %72, %79 : vector<8x32xf32>
    %81 = arith.mulf %80, %80 : vector<8x32xf32>
    %cst_46 = arith.constant dense<0.000000e+00> : vector<8xf32>
    %82 = vector.multi_reduction <add>, %81, %cst_46 [1] : vector<8x32xf32> to vector<8xf32>
    %83 = vector.shape_cast %82 : vector<8xf32> to vector<8x1xf32>
    %cst_47 = arith.constant 3.200000e+01 : f32
    %84 = vector.broadcast %cst_47 : f32 to vector<8x1xf32>
    %85 = arith.divf %83, %84 : vector<8x1xf32>
    %86 = vector.broadcast %78 : vector<8x1xf32> to vector<8x32xf32>
    %87 = arith.subf %72, %86 : vector<8x32xf32>
    %cst_48 = arith.constant 9.99999974E-6 : f32
    %88 = vector.broadcast %cst_48 : f32 to vector<8x1xf32>
    %89 = arith.addf %85, %88 : vector<8x1xf32>
    %90 = math.rsqrt %89 : vector<8x1xf32>
    %91 = vector.broadcast %90 : vector<8x1xf32> to vector<8x32xf32>
    %92 = arith.mulf %87, %91 : vector<8x32xf32>
    %93 = vector.broadcast %73 : vector<1x32xf32> to vector<8x32xf32>
    %94 = arith.mulf %92, %93 : vector<8x32xf32>
    %95 = vector.broadcast %74 : vector<1x32xf32> to vector<8x32xf32>
    %96 = arith.addf %94, %95 : vector<8x32xf32>
    %c0_49 = arith.constant 0 : index
    %c0_50 = arith.constant 0 : index
    %97 = vector.load %arg19[%c0_49, %c0_50] : memref<1x32xf32, #tpu.memory_space<vmem>>, vector<1x32xf32>
    %c0_51 = arith.constant 0 : index
    %c0_52 = arith.constant 0 : index
    %98 = vector.load %arg20[%c0_51, %c0_52] : memref<1x32xf32, #tpu.memory_space<vmem>>, vector<1x32xf32>
    %cst_53 = arith.constant dense<0.000000e+00> : vector<8xf32>
    %99 = vector.multi_reduction <add>, %96, %cst_53 [1] : vector<8x32xf32> to vector<8xf32>
    %100 = vector.shape_cast %99 : vector<8xf32> to vector<8x1xf32>
    %cst_54 = arith.constant 3.200000e+01 : f32
    %101 = vector.broadcast %cst_54 : f32 to vector<8x1xf32>
    %102 = arith.divf %100, %101 : vector<8x1xf32>
    %103 = vector.broadcast %102 : vector<8x1xf32> to vector<8x32xf32>
    %104 = arith.subf %96, %103 : vector<8x32xf32>
    %105 = arith.mulf %104, %104 : vector<8x32xf32>
    %cst_55 = arith.constant dense<0.000000e+00> : vector<8xf32>
    %106 = vector.multi_reduction <add>, %105, %cst_55 [1] : vector<8x32xf32> to vector<8xf32>
    %107 = vector.shape_cast %106 : vector<8xf32> to vector<8x1xf32>
    %cst_56 = arith.constant 3.200000e+01 : f32
    %108 = vector.broadcast %cst_56 : f32 to vector<8x1xf32>
    %109 = arith.divf %107, %108 : vector<8x1xf32>
    %110 = vector.broadcast %102 : vector<8x1xf32> to vector<8x32xf32>
    %111 = arith.subf %96, %110 : vector<8x32xf32>
    %cst_57 = arith.constant 9.99999974E-6 : f32
    %112 = vector.broadcast %cst_57 : f32 to vector<8x1xf32>
    %113 = arith.addf %109, %112 : vector<8x1xf32>
    %114 = math.rsqrt %113 : vector<8x1xf32>
    %115 = vector.broadcast %114 : vector<8x1xf32> to vector<8x32xf32>
    %116 = arith.mulf %111, %115 : vector<8x32xf32>
    %117 = vector.broadcast %97 : vector<1x32xf32> to vector<8x32xf32>
    %118 = arith.mulf %116, %117 : vector<8x32xf32>
    %119 = vector.broadcast %98 : vector<1x32xf32> to vector<8x32xf32>
    %120 = arith.addf %118, %119 : vector<8x32xf32>
    %121 = arith.truncf %120 : vector<8x32xf32> to vector<8x32xbf16>
    %c0_58 = arith.constant 0 : index
    %c0_59 = arith.constant 0 : index
    %c0_60 = arith.constant 0 : index
    %122 = vector.load %arg21[%c0_58, %c0_59, %c0_60] : memref<1x8x32xbf16, #tpu.memory_space<vmem>>, vector<1x8x32xbf16>
    %123 = vector.shape_cast %122 : vector<1x8x32xbf16> to vector<8x32xbf16>
    %124 = vector.shape_cast %121 : vector<8x32xbf16> to vector<1x8x32xbf16>
    tpu.vector_store %arg21[%c0_58, %c0_59, %c0_60], %124 {strides = array<i32>} : memref<1x8x32xbf16, #tpu.memory_space<vmem>>, vector<1x8x32xbf16>,
    return
  }
  func.func @transform_0(%arg0: i32, %arg1: i32) -> (i32, i32, i32) {
    %c0_i32 = arith.constant 0 : i32
    %c0_i32_0 = arith.constant 0 : i32
    %c0_i32_1 = arith.constant 0 : i32
    return %arg0, %c0_i32, %c0_i32_0 : i32, i32, i32
  }
  func.func @transform_1(%arg0: i32, %arg1: i32) -> (i32, i32) {
    %c0_i32 = arith.constant 0 : i32
    %c0_i32_0 = arith.constant 0 : i32
    %c0_i32_1 = arith.constant 0 : i32
    return %c0_i32, %c0_i32_0 : i32, i32
  }
  func.func @transform_2(%arg0: i32, %arg1: i32) -> (i32, i32) {
    %c0_i32 = arith.constant 0 : i32
    %c0_i32_0 = arith.constant 0 : i32
    %c0_i32_1 = arith.constant 0 : i32
    return %c0_i32, %c0_i32_0 : i32, i32
  }
  func.func @transform_3(%arg0: i32, %arg1: i32) -> (i32, i32) {
    %c0_i32 = arith.constant 0 : i32
    %c0_i32_0 = arith.constant 0 : i32
    %c0_i32_1 = arith.constant 0 : i32
    return %c0_i32, %c0_i32_0 : i32, i32
  }
  func.func @transform_4(%arg0: i32, %arg1: i32) -> (i32, i32) {
    %c0_i32 = arith.constant 0 : i32
    %c0_i32_0 = arith.constant 0 : i32
    %c0_i32_1 = arith.constant 0 : i32
    return %c0_i32, %c0_i32_0 : i32, i32
  }
  func.func @transform_5(%arg0: i32, %arg1: i32) -> (i32, i32) {
    %c0_i32 = arith.constant 0 : i32
    %c0_i32_0 = arith.constant 0 : i32
    %c0_i32_1 = arith.constant 0 : i32
    return %c0_i32, %c0_i32_0 : i32, i32
  }
  func.func @transform_6(%arg0: i32, %arg1: i32) -> (i32, i32) {
    %c0_i32 = arith.constant 0 : i32
    %c0_i32_0 = arith.constant 0 : i32
    %c0_i32_1 = arith.constant 0 : i32
    return %c0_i32, %c0_i32_0 : i32, i32
  }
  func.func @transform_7(%arg0: i32, %arg1: i32) -> (i32, i32, i32) {
    %c0_i32 = arith.constant 0 : i32
    %c0_i32_0 = arith.constant 0 : i32
    %c0_i32_1 = arith.constant 0 : i32
    %c0_i32_2 = arith.constant 0 : i32
    return %c0_i32, %c0_i32_0, %c0_i32_1 : i32, i32, i32
  }
  func.func @transform_8(%arg0: i32, %arg1: i32) -> (i32, i32) {
    %c0_i32 = arith.constant 0 : i32
    %c0_i32_0 = arith.constant 0 : i32
    %c0_i32_1 = arith.constant 0 : i32
    return %c0_i32, %c0_i32_0 : i32, i32
  }
  func.func @transform_9(%arg0: i32, %arg1: i32) -> (i32, i32) {
    %c0_i32 = arith.constant 0 : i32
    %c0_i32_0 = arith.constant 0 : i32
    %c0_i32_1 = arith.constant 0 : i32
    return %c0_i32, %c0_i32_0 : i32, i32
  }
  func.func @transform_10(%arg0: i32, %arg1: i32) -> (i32, i32) {
    %c0_i32 = arith.constant 0 : i32
    %c0_i32_0 = arith.constant 0 : i32
    %c0_i32_1 = arith.constant 0 : i32
    return %c0_i32, %c0_i32_0 : i32, i32
  }
  func.func @transform_11(%arg0: i32, %arg1: i32) -> (i32, i32) {
    %c0_i32 = arith.constant 0 : i32
    %c0_i32_0 = arith.constant 0 : i32
    %c0_i32_1 = arith.constant 0 : i32
    return %c0_i32, %c0_i32_0 : i32, i32
  }
  func.func @transform_12(%arg0: i32, %arg1: i32) -> (i32, i32) {
    %c0_i32 = arith.constant 0 : i32
    %c0_i32_0 = arith.constant 0 : i32
    %c0_i32_1 = arith.constant 0 : i32
    return %c0_i32, %c0_i32_0 : i32, i32
  }
  func.func @transform_13(%arg0: i32, %arg1: i32) -> (i32, i32) {
    %c0_i32 = arith.constant 0 : i32
    %c0_i32_0 = arith.constant 0 : i32
    %c0_i32_1 = arith.constant 0 : i32
    return %c0_i32, %c0_i32_0 : i32, i32
  }
  func.func @transform_14(%arg0: i32, %arg1: i32) -> (i32, i32) {
    %c0_i32 = arith.constant 0 : i32
    %c0_i32_0 = arith.constant 0 : i32
    %c0_i32_1 = arith.constant 0 : i32
    return %c0_i32, %c0_i32_0 : i32, i32
  }
  func.func @transform_15(%arg0: i32, %arg1: i32) -> (i32, i32) {
    %c0_i32 = arith.constant 0 : i32
    %c0_i32_0 = arith.constant 0 : i32
    %c0_i32_1 = arith.constant 0 : i32
    return %c0_i32, %c0_i32_0 : i32, i32
  }
  func.func @transform_16(%arg0: i32, %arg1: i32) -> (i32, i32) {
    %c0_i32 = arith.constant 0 : i32
    %c0_i32_0 = arith.constant 0 : i32
    %c0_i32_1 = arith.constant 0 : i32
    return %c0_i32, %c0_i32_0 : i32, i32
  }
  func.func @transform_17(%arg0: i32, %arg1: i32) -> (i32, i32) {
    %c0_i32 = arith.constant 0 : i32
    %c0_i32_0 = arith.constant 0 : i32
    %c0_i32_1 = arith.constant 0 : i32
    return %c0_i32, %c0_i32_0 : i32, i32
  }
  func.func @transform_18(%arg0: i32, %arg1: i32) -> (i32, i32) {
    %c0_i32 = arith.constant 0 : i32
    %c0_i32_0 = arith.constant 0 : i32
    %c0_i32_1 = arith.constant 0 : i32
    return %c0_i32, %c0_i32_0 : i32, i32
  }
  func.func @transform_19(%arg0: i32, %arg1: i32) -> (i32, i32, i32) {
    %c0_i32 = arith.constant 0 : i32
    %c0_i32_0 = arith.constant 0 : i32
    return %arg0, %arg1, %c0_i32 : i32, i32, i32
  }
}

module attributes {stable_mosaic.version = 11 : i64} {
  func.func @_encoder_layer_kernel(%arg0: i32, %arg1: i32, %arg2: memref<1x8x32xbf16, #tpu.memory_space<vmem>>, %arg3: memref<32x32xbf16, #tpu.memory_space<vmem>>, %arg4: memref<1x32xf32, #tpu.memory_space<vmem>>, %arg5: memref<32x32xbf16, #tpu.memory_space<vmem>>, %arg6: memref<1x32xf32, #tpu.memory_space<vmem>>, %arg7: memref<32x32xbf16, #tpu.memory_space<vmem>>, %arg8: memref<1x32xf32, #tpu.memory_space<vmem>>, %arg9: memref<4x8x32xbf16, #tpu.memory_space<vmem>>, %arg10: memref<1x32xf32, #tpu.memory_space<vmem>>, %arg11: memref<32x64xbf16, #tpu.memory_space<vmem>>, %arg12: memref<1x64xf32, #tpu.memory_space<vmem>>, %arg13: memref<64x32xbf16, #tpu.memory_space<vmem>>, %arg14: memref<1x32xf32, #tpu.memory_space<vmem>>, %arg15: memref<1x32xf32, #tpu.memory_space<vmem>>, %arg16: memref<1x32xf32, #tpu.memory_space<vmem>>, %arg17: memref<1x32xf32, #tpu.memory_space<vmem>>, %arg18: memref<1x32xf32, #tpu.memory_space<vmem>>, %arg19: memref<1x8x32xbf16, #tpu.memory_space<vmem>>, %arg20: memref<4x8x8xbf16, #tpu.memory_space<vmem>>, %arg21: memref<4x8x8xbf16, #tpu.memory_space<vmem>>, %arg22: memref<4x8x8xbf16, #tpu.memory_space<vmem>>) attributes {dimension_semantics = [#tpu.dimension_semantics<parallel>, #tpu.dimension_semantics<arbitrary>], iteration_bounds = array<i64: 2, 1>, scalar_prefetch = 0 : i64, scratch_operands = 3 : i64, tpu.core_type = #tpu.core_type<tc>, window_params = [{transform_indices = @transform_0, window_bounds = array<i64: 1, 8, 32>}, {pipeline_mode = #tpu.pipeline_mode<synchronous>, transform_indices = @transform_1, window_bounds = array<i64: 32, 32>}, {pipeline_mode = #tpu.pipeline_mode<synchronous>, transform_indices = @transform_2, window_bounds = array<i64: 1, 32>}, {pipeline_mode = #tpu.pipeline_mode<synchronous>, transform_indices = @transform_3, window_bounds = array<i64: 32, 32>}, {pipeline_mode = #tpu.pipeline_mode<synchronous>, transform_indices = @transform_4, window_bounds = array<i64: 1, 32>}, {pipeline_mode = #tpu.pipeline_mode<synchronous>, transform_indices = @transform_5, window_bounds = array<i64: 32, 32>}, {pipeline_mode = #tpu.pipeline_mode<synchronous>, transform_indices = @transform_6, window_bounds = array<i64: 1, 32>}, {pipeline_mode = #tpu.pipeline_mode<synchronous>, transform_indices = @transform_7, window_bounds = array<i64: 4, 8, 32>}, {pipeline_mode = #tpu.pipeline_mode<synchronous>, transform_indices = @transform_8, window_bounds = array<i64: 1, 32>}, {pipeline_mode = #tpu.pipeline_mode<synchronous>, transform_indices = @transform_9, window_bounds = array<i64: 32, 64>}, {pipeline_mode = #tpu.pipeline_mode<synchronous>, transform_indices = @transform_10, window_bounds = array<i64: 1, 64>}, {pipeline_mode = #tpu.pipeline_mode<synchronous>, transform_indices = @transform_11, window_bounds = array<i64: 64, 32>}, {pipeline_mode = #tpu.pipeline_mode<synchronous>, transform_indices = @transform_12, window_bounds = array<i64: 1, 32>}, {pipeline_mode = #tpu.pipeline_mode<synchronous>, transform_indices = @transform_13, window_bounds = array<i64: 1, 32>}, {pipeline_mode = #tpu.pipeline_mode<synchronous>, transform_indices = @transform_14, window_bounds = array<i64: 1, 32>}, {pipeline_mode = #tpu.pipeline_mode<synchronous>, transform_indices = @transform_15, window_bounds = array<i64: 1, 32>}, {pipeline_mode = #tpu.pipeline_mode<synchronous>, transform_indices = @transform_16, window_bounds = array<i64: 1, 32>}, {transform_indices = @transform_17, window_bounds = array<i64: 1, 8, 32>}]} {
    %c0_i32 = arith.constant 0 : i32
    %0 = arith.cmpi eq, %arg1, %c0_i32 : i32
    %1 = arith.extui %0 : i1 to i32
    %c0_i32_0 = arith.constant 0 : i32
    %2 = arith.cmpi ne, %1, %c0_i32_0 : i32
    scf.if %2 {
      %c0_52 = arith.constant 0 : index
      %c0_53 = arith.constant 0 : index
      %c0_54 = arith.constant 0 : index
      %101 = vector.load %arg2[%c0_52, %c0_53, %c0_54] : memref<1x8x32xbf16, #tpu.memory_space<vmem>>, vector<1x8x32xbf16>
      %102 = vector.shape_cast %101 : vector<1x8x32xbf16> to vector<8x32xbf16>
      %c0_55 = arith.constant 0 : index
      %c0_56 = arith.constant 0 : index
      %103 = vector.load %arg3[%c0_55, %c0_56] : memref<32x32xbf16, #tpu.memory_space<vmem>>, vector<32x32xbf16>
      %cst_57 = arith.constant dense<0.000000e+00> : vector<8x32xf32>
      %104 = tpu.matmul %102, %103, %cst_57 {dimension_numbers = #tpu.dot_dimension_numbers<[1], [0], [0], [1], [0, 0, 1, 1], [], []>} : vector<8x32xbf16>, vector<32x32xbf16>, vector<8x32xf32> -> vector<8x32xf32>
      %c0_58 = arith.constant 0 : index
      %c0_59 = arith.constant 0 : index
      %105 = vector.load %arg4[%c0_58, %c0_59] : memref<1x32xf32, #tpu.memory_space<vmem>>, vector<1x32xf32>
      %106 = vector.broadcast %105 : vector<1x32xf32> to vector<8x32xf32>
      %107 = arith.addf %104, %106 : vector<8x32xf32>
      %108 = arith.truncf %107 : vector<8x32xf32> to vector<8x32xbf16>
      %109 = vector.extract_strided_slice %108 {offsets = [0, 0], sizes = [8, 8], strides = [1, 1]} : vector<8x32xbf16> to vector<8x8xbf16>
      %c0_60 = arith.constant 0 : index
      %c0_61 = arith.constant 0 : index
      %c0_62 = arith.constant 0 : index
      %110 = vector.load %arg20[%c0_60, %c0_61, %c0_62] : memref<4x8x8xbf16, #tpu.memory_space<vmem>>, vector<1x8x8xbf16>
      %111 = vector.shape_cast %110 : vector<1x8x8xbf16> to vector<8x8xbf16>
      %112 = vector.shape_cast %109 : vector<8x8xbf16> to vector<1x8x8xbf16>
      tpu.vector_store %arg20[%c0_60, %c0_61, %c0_62], %112 {strides = array<i32>} : memref<4x8x8xbf16, #tpu.memory_space<vmem>>, vector<1x8x8xbf16>,
      %113 = vector.extract_strided_slice %108 {offsets = [0, 8], sizes = [8, 8], strides = [1, 1]} : vector<8x32xbf16> to vector<8x8xbf16>
      %c1 = arith.constant 1 : index
      %c0_63 = arith.constant 0 : index
      %c0_64 = arith.constant 0 : index
      %114 = vector.load %arg20[%c1, %c0_63, %c0_64] : memref<4x8x8xbf16, #tpu.memory_space<vmem>>, vector<1x8x8xbf16>
      %115 = vector.shape_cast %114 : vector<1x8x8xbf16> to vector<8x8xbf16>
      %116 = vector.shape_cast %113 : vector<8x8xbf16> to vector<1x8x8xbf16>
      tpu.vector_store %arg20[%c1, %c0_63, %c0_64], %116 {strides = array<i32>} : memref<4x8x8xbf16, #tpu.memory_space<vmem>>, vector<1x8x8xbf16>,
      %117 = vector.extract_strided_slice %108 {offsets = [0, 16], sizes = [8, 8], strides = [1, 1]} : vector<8x32xbf16> to vector<8x8xbf16>
      %c2 = arith.constant 2 : index
      %c0_65 = arith.constant 0 : index
      %c0_66 = arith.constant 0 : index
      %118 = vector.load %arg20[%c2, %c0_65, %c0_66] : memref<4x8x8xbf16, #tpu.memory_space<vmem>>, vector<1x8x8xbf16>
      %119 = vector.shape_cast %118 : vector<1x8x8xbf16> to vector<8x8xbf16>
      %120 = vector.shape_cast %117 : vector<8x8xbf16> to vector<1x8x8xbf16>
      tpu.vector_store %arg20[%c2, %c0_65, %c0_66], %120 {strides = array<i32>} : memref<4x8x8xbf16, #tpu.memory_space<vmem>>, vector<1x8x8xbf16>,
      %121 = vector.extract_strided_slice %108 {offsets = [0, 24], sizes = [8, 8], strides = [1, 1]} : vector<8x32xbf16> to vector<8x8xbf16>
      %c3 = arith.constant 3 : index
      %c0_67 = arith.constant 0 : index
      %c0_68 = arith.constant 0 : index
      %122 = vector.load %arg20[%c3, %c0_67, %c0_68] : memref<4x8x8xbf16, #tpu.memory_space<vmem>>, vector<1x8x8xbf16>
      %123 = vector.shape_cast %122 : vector<1x8x8xbf16> to vector<8x8xbf16>
      %124 = vector.shape_cast %121 : vector<8x8xbf16> to vector<1x8x8xbf16>
      tpu.vector_store %arg20[%c3, %c0_67, %c0_68], %124 {strides = array<i32>} : memref<4x8x8xbf16, #tpu.memory_space<vmem>>, vector<1x8x8xbf16>,
      %c0_69 = arith.constant 0 : index
      %c0_70 = arith.constant 0 : index
      %125 = vector.load %arg5[%c0_69, %c0_70] : memref<32x32xbf16, #tpu.memory_space<vmem>>, vector<32x32xbf16>
      %cst_71 = arith.constant dense<0.000000e+00> : vector<8x32xf32>
      %126 = tpu.matmul %102, %125, %cst_71 {dimension_numbers = #tpu.dot_dimension_numbers<[1], [0], [0], [1], [0, 0, 1, 1], [], []>} : vector<8x32xbf16>, vector<32x32xbf16>, vector<8x32xf32> -> vector<8x32xf32>
      %c0_72 = arith.constant 0 : index
      %c0_73 = arith.constant 0 : index
      %127 = vector.load %arg6[%c0_72, %c0_73] : memref<1x32xf32, #tpu.memory_space<vmem>>, vector<1x32xf32>
      %128 = vector.broadcast %127 : vector<1x32xf32> to vector<8x32xf32>
      %129 = arith.addf %126, %128 : vector<8x32xf32>
      %130 = arith.truncf %129 : vector<8x32xf32> to vector<8x32xbf16>
      %131 = vector.extract_strided_slice %130 {offsets = [0, 0], sizes = [8, 8], strides = [1, 1]} : vector<8x32xbf16> to vector<8x8xbf16>
      %c0_74 = arith.constant 0 : index
      %c0_75 = arith.constant 0 : index
      %c0_76 = arith.constant 0 : index
      %132 = vector.load %arg21[%c0_74, %c0_75, %c0_76] : memref<4x8x8xbf16, #tpu.memory_space<vmem>>, vector<1x8x8xbf16>
      %133 = vector.shape_cast %132 : vector<1x8x8xbf16> to vector<8x8xbf16>
      %134 = vector.shape_cast %131 : vector<8x8xbf16> to vector<1x8x8xbf16>
      tpu.vector_store %arg21[%c0_74, %c0_75, %c0_76], %134 {strides = array<i32>} : memref<4x8x8xbf16, #tpu.memory_space<vmem>>, vector<1x8x8xbf16>,
      %135 = vector.extract_strided_slice %130 {offsets = [0, 8], sizes = [8, 8], strides = [1, 1]} : vector<8x32xbf16> to vector<8x8xbf16>
      %c1_77 = arith.constant 1 : index
      %c0_78 = arith.constant 0 : index
      %c0_79 = arith.constant 0 : index
      %136 = vector.load %arg21[%c1_77, %c0_78, %c0_79] : memref<4x8x8xbf16, #tpu.memory_space<vmem>>, vector<1x8x8xbf16>
      %137 = vector.shape_cast %136 : vector<1x8x8xbf16> to vector<8x8xbf16>
      %138 = vector.shape_cast %135 : vector<8x8xbf16> to vector<1x8x8xbf16>
      tpu.vector_store %arg21[%c1_77, %c0_78, %c0_79], %138 {strides = array<i32>} : memref<4x8x8xbf16, #tpu.memory_space<vmem>>, vector<1x8x8xbf16>,
      %139 = vector.extract_strided_slice %130 {offsets = [0, 16], sizes = [8, 8], strides = [1, 1]} : vector<8x32xbf16> to vector<8x8xbf16>
      %c2_80 = arith.constant 2 : index
      %c0_81 = arith.constant 0 : index
      %c0_82 = arith.constant 0 : index
      %140 = vector.load %arg21[%c2_80, %c0_81, %c0_82] : memref<4x8x8xbf16, #tpu.memory_space<vmem>>, vector<1x8x8xbf16>
      %141 = vector.shape_cast %140 : vector<1x8x8xbf16> to vector<8x8xbf16>
      %142 = vector.shape_cast %139 : vector<8x8xbf16> to vector<1x8x8xbf16>
      tpu.vector_store %arg21[%c2_80, %c0_81, %c0_82], %142 {strides = array<i32>} : memref<4x8x8xbf16, #tpu.memory_space<vmem>>, vector<1x8x8xbf16>,
      %143 = vector.extract_strided_slice %130 {offsets = [0, 24], sizes = [8, 8], strides = [1, 1]} : vector<8x32xbf16> to vector<8x8xbf16>
      %c3_83 = arith.constant 3 : index
      %c0_84 = arith.constant 0 : index
      %c0_85 = arith.constant 0 : index
      %144 = vector.load %arg21[%c3_83, %c0_84, %c0_85] : memref<4x8x8xbf16, #tpu.memory_space<vmem>>, vector<1x8x8xbf16>
      %145 = vector.shape_cast %144 : vector<1x8x8xbf16> to vector<8x8xbf16>
      %146 = vector.shape_cast %143 : vector<8x8xbf16> to vector<1x8x8xbf16>
      tpu.vector_store %arg21[%c3_83, %c0_84, %c0_85], %146 {strides = array<i32>} : memref<4x8x8xbf16, #tpu.memory_space<vmem>>, vector<1x8x8xbf16>,
      %c0_86 = arith.constant 0 : index
      %c0_87 = arith.constant 0 : index
      %147 = vector.load %arg7[%c0_86, %c0_87] : memref<32x32xbf16, #tpu.memory_space<vmem>>, vector<32x32xbf16>
      %cst_88 = arith.constant dense<0.000000e+00> : vector<8x32xf32>
      %148 = tpu.matmul %102, %147, %cst_88 {dimension_numbers = #tpu.dot_dimension_numbers<[1], [0], [0], [1], [0, 0, 1, 1], [], []>} : vector<8x32xbf16>, vector<32x32xbf16>, vector<8x32xf32> -> vector<8x32xf32>
      %c0_89 = arith.constant 0 : index
      %c0_90 = arith.constant 0 : index
      %149 = vector.load %arg8[%c0_89, %c0_90] : memref<1x32xf32, #tpu.memory_space<vmem>>, vector<1x32xf32>
      %150 = vector.broadcast %149 : vector<1x32xf32> to vector<8x32xf32>
      %151 = arith.addf %148, %150 : vector<8x32xf32>
      %152 = arith.truncf %151 : vector<8x32xf32> to vector<8x32xbf16>
      %153 = vector.extract_strided_slice %152 {offsets = [0, 0], sizes = [8, 8], strides = [1, 1]} : vector<8x32xbf16> to vector<8x8xbf16>
      %c0_91 = arith.constant 0 : index
      %c0_92 = arith.constant 0 : index
      %c0_93 = arith.constant 0 : index
      %154 = vector.load %arg22[%c0_91, %c0_92, %c0_93] : memref<4x8x8xbf16, #tpu.memory_space<vmem>>, vector<1x8x8xbf16>
      %155 = vector.shape_cast %154 : vector<1x8x8xbf16> to vector<8x8xbf16>
      %156 = vector.shape_cast %153 : vector<8x8xbf16> to vector<1x8x8xbf16>
      tpu.vector_store %arg22[%c0_91, %c0_92, %c0_93], %156 {strides = array<i32>} : memref<4x8x8xbf16, #tpu.memory_space<vmem>>, vector<1x8x8xbf16>,
      %157 = vector.extract_strided_slice %152 {offsets = [0, 8], sizes = [8, 8], strides = [1, 1]} : vector<8x32xbf16> to vector<8x8xbf16>
      %c1_94 = arith.constant 1 : index
      %c0_95 = arith.constant 0 : index
      %c0_96 = arith.constant 0 : index
      %158 = vector.load %arg22[%c1_94, %c0_95, %c0_96] : memref<4x8x8xbf16, #tpu.memory_space<vmem>>, vector<1x8x8xbf16>
      %159 = vector.shape_cast %158 : vector<1x8x8xbf16> to vector<8x8xbf16>
      %160 = vector.shape_cast %157 : vector<8x8xbf16> to vector<1x8x8xbf16>
      tpu.vector_store %arg22[%c1_94, %c0_95, %c0_96], %160 {strides = array<i32>} : memref<4x8x8xbf16, #tpu.memory_space<vmem>>, vector<1x8x8xbf16>,
      %161 = vector.extract_strided_slice %152 {offsets = [0, 16], sizes = [8, 8], strides = [1, 1]} : vector<8x32xbf16> to vector<8x8xbf16>
      %c2_97 = arith.constant 2 : index
      %c0_98 = arith.constant 0 : index
      %c0_99 = arith.constant 0 : index
      %162 = vector.load %arg22[%c2_97, %c0_98, %c0_99] : memref<4x8x8xbf16, #tpu.memory_space<vmem>>, vector<1x8x8xbf16>
      %163 = vector.shape_cast %162 : vector<1x8x8xbf16> to vector<8x8xbf16>
      %164 = vector.shape_cast %161 : vector<8x8xbf16> to vector<1x8x8xbf16>
      tpu.vector_store %arg22[%c2_97, %c0_98, %c0_99], %164 {strides = array<i32>} : memref<4x8x8xbf16, #tpu.memory_space<vmem>>, vector<1x8x8xbf16>,
      %165 = vector.extract_strided_slice %152 {offsets = [0, 24], sizes = [8, 8], strides = [1, 1]} : vector<8x32xbf16> to vector<8x8xbf16>
      %c3_100 = arith.constant 3 : index
      %c0_101 = arith.constant 0 : index
      %c0_102 = arith.constant 0 : index
      %166 = vector.load %arg22[%c3_100, %c0_101, %c0_102] : memref<4x8x8xbf16, #tpu.memory_space<vmem>>, vector<1x8x8xbf16>
      %167 = vector.shape_cast %166 : vector<1x8x8xbf16> to vector<8x8xbf16>
      %168 = vector.shape_cast %165 : vector<8x8xbf16> to vector<1x8x8xbf16>
      tpu.vector_store %arg22[%c3_100, %c0_101, %c0_102], %168 {strides = array<i32>} : memref<4x8x8xbf16, #tpu.memory_space<vmem>>, vector<1x8x8xbf16>,
    } else {
    }
    %c8_i32 = arith.constant 8 : i32
    %3 = arith.muli %arg1, %c8_i32 : i32
    %4 = tpu.assume_multiple %3, 8 : i32
    %c0 = arith.constant 0 : index
    %5 = arith.index_cast %4 : i32 to index
    %c0_1 = arith.constant 0 : index
    %6 = vector.load %arg20[%c0, %5, %c0_1] : memref<4x8x8xbf16, #tpu.memory_space<vmem>>, vector<4x8x8xbf16>
    %c0_2 = arith.constant 0 : index
    %c0_3 = arith.constant 0 : index
    %c0_4 = arith.constant 0 : index
    %7 = vector.load %arg21[%c0_2, %c0_3, %c0_4] : memref<4x8x8xbf16, #tpu.memory_space<vmem>>, vector<4x8x8xbf16>
    %c0_5 = arith.constant 0 : index
    %c0_6 = arith.constant 0 : index
    %c0_7 = arith.constant 0 : index
    %8 = vector.load %arg22[%c0_5, %c0_6, %c0_7] : memref<4x8x8xbf16, #tpu.memory_space<vmem>>, vector<4x8x8xbf16>
    "tpu.trace_start"() <{level = 10 : i32, message = "hqd,hkd->hqk"}> : () -> ()
    %cst = arith.constant dense<0.000000e+00> : vector<4x8x8xf32>
    %9 = tpu.matmul %6, %7, %cst {dimension_numbers = #tpu.dot_dimension_numbers<[2], [2], [1], [1], [0, 0, 0, 1, 1, 1], [0], [0]>} : vector<4x8x8xbf16>, vector<4x8x8xbf16>, vector<4x8x8xf32> -> vector<4x8x8xf32>
    "tpu.trace_stop"() : () -> ()
    %cst_8 = arith.constant dense<0xFF800000> : vector<4x8xf32>
    %10 = vector.multi_reduction <maximumf>, %9, %cst_8 [2] : vector<4x8x8xf32> to vector<4x8xf32>
    %11 = vector.shape_cast %10 : vector<4x8xf32> to vector<4x8x1xf32>
    %12 = vector.broadcast %11 : vector<4x8x1xf32> to vector<4x8x8xf32>
    %13 = arith.subf %9, %12 : vector<4x8x8xf32>
    %14 = math.exp %13 : vector<4x8x8xf32>
    %cst_9 = arith.constant dense<0.000000e+00> : vector<4x8xf32>
    %15 = vector.multi_reduction <add>, %14, %cst_9 [2] : vector<4x8x8xf32> to vector<4x8xf32>
    %16 = vector.shape_cast %15 : vector<4x8xf32> to vector<4x8x1xf32>
    %17 = tpu.reciprocal %16 {approx = true} : vector<4x8x1xf32> -> vector<4x8x1xf32>
    %18 = vector.broadcast %17 : vector<4x8x1xf32> to vector<4x8x8xf32>
    %19 = arith.mulf %14, %18 : vector<4x8x8xf32>
    %20 = arith.truncf %19 : vector<4x8x8xf32> to vector<4x8x8xbf16>
    "tpu.trace_start"() <{level = 10 : i32, message = "hqk,hkd->hqd"}> : () -> ()
    %cst_10 = arith.constant dense<0.000000e+00> : vector<4x8x8xf32>
    %21 = tpu.matmul %20, %8, %cst_10 {dimension_numbers = #tpu.dot_dimension_numbers<[2], [1], [1], [2], [0, 0, 0, 1, 1, 2], [0], [0]>} : vector<4x8x8xbf16>, vector<4x8x8xbf16>, vector<4x8x8xf32> -> vector<4x8x8xf32>
    "tpu.trace_stop"() : () -> ()
    %22 = arith.truncf %21 : vector<4x8x8xf32> to vector<4x8x8xbf16>
    %c0_11 = arith.constant 0 : index
    %c0_12 = arith.constant 0 : index
    %c0_13 = arith.constant 0 : index
    %23 = vector.load %arg9[%c0_11, %c0_12, %c0_13] : memref<4x8x32xbf16, #tpu.memory_space<vmem>>, vector<4x8x32xbf16>
    "tpu.trace_start"() <{level = 10 : i32, message = "hqd,hdn->hqn"}> : () -> ()
    %cst_14 = arith.constant dense<0.000000e+00> : vector<4x8x32xf32>
    %24 = tpu.matmul %22, %23, %cst_14 {dimension_numbers = #tpu.dot_dimension_numbers<[2], [1], [1], [2], [0, 0, 0, 1, 1, 2], [0], [0]>} : vector<4x8x8xbf16>, vector<4x8x32xbf16>, vector<4x8x32xf32> -> vector<4x8x32xf32>
    "tpu.trace_stop"() : () -> ()
    %cst_15 = arith.constant dense<0.000000e+00> : vector<8x32xf32>
    %25 = vector.multi_reduction <add>, %24, %cst_15 [0] : vector<4x8x32xf32> to vector<8x32xf32>
    %c0_16 = arith.constant 0 : index
    %c0_17 = arith.constant 0 : index
    %26 = vector.load %arg10[%c0_16, %c0_17] : memref<1x32xf32, #tpu.memory_space<vmem>>, vector<1x32xf32>
    %27 = vector.broadcast %26 : vector<1x32xf32> to vector<8x32xf32>
    %28 = arith.addf %25, %27 : vector<8x32xf32>
    %c0_18 = arith.constant 0 : index
    %29 = arith.index_cast %4 : i32 to index
    %c0_19 = arith.constant 0 : index
    %30 = vector.load %arg2[%c0_18, %29, %c0_19] : memref<1x8x32xbf16, #tpu.memory_space<vmem>>, vector<1x8x32xbf16>
    %31 = vector.shape_cast %30 : vector<1x8x32xbf16> to vector<8x32xbf16>
    %32 = arith.extf %31 : vector<8x32xbf16> to vector<8x32xf32>
    %33 = arith.addf %32, %28 : vector<8x32xf32>
    %c0_20 = arith.constant 0 : index
    %c0_21 = arith.constant 0 : index
    %34 = vector.load %arg15[%c0_20, %c0_21] : memref<1x32xf32, #tpu.memory_space<vmem>>, vector<1x32xf32>
    %c0_22 = arith.constant 0 : index
    %c0_23 = arith.constant 0 : index
    %35 = vector.load %arg16[%c0_22, %c0_23] : memref<1x32xf32, #tpu.memory_space<vmem>>, vector<1x32xf32>
    %cst_24 = arith.constant dense<0.000000e+00> : vector<8xf32>
    %36 = vector.multi_reduction <add>, %33, %cst_24 [1] : vector<8x32xf32> to vector<8xf32>
    %37 = vector.shape_cast %36 : vector<8xf32> to vector<8x1xf32>
    %cst_25 = arith.constant 3.200000e+01 : f32
    %38 = vector.broadcast %cst_25 : f32 to vector<8x1xf32>
    %39 = arith.divf %37, %38 : vector<8x1xf32>
    %40 = vector.broadcast %39 : vector<8x1xf32> to vector<8x32xf32>
    %41 = arith.subf %33, %40 : vector<8x32xf32>
    %42 = arith.mulf %41, %41 : vector<8x32xf32>
    %cst_26 = arith.constant dense<0.000000e+00> : vector<8xf32>
    %43 = vector.multi_reduction <add>, %42, %cst_26 [1] : vector<8x32xf32> to vector<8xf32>
    %44 = vector.shape_cast %43 : vector<8xf32> to vector<8x1xf32>
    %cst_27 = arith.constant 3.200000e+01 : f32
    %45 = vector.broadcast %cst_27 : f32 to vector<8x1xf32>
    %46 = arith.divf %44, %45 : vector<8x1xf32>
    %47 = vector.broadcast %39 : vector<8x1xf32> to vector<8x32xf32>
    %48 = arith.subf %33, %47 : vector<8x32xf32>
    %cst_28 = arith.constant 9.99999974E-6 : f32
    %49 = vector.broadcast %cst_28 : f32 to vector<8x1xf32>
    %50 = arith.addf %46, %49 : vector<8x1xf32>
    %51 = math.rsqrt %50 : vector<8x1xf32>
    %52 = vector.broadcast %51 : vector<8x1xf32> to vector<8x32xf32>
    %53 = arith.mulf %48, %52 : vector<8x32xf32>
    %54 = vector.broadcast %34 : vector<1x32xf32> to vector<8x32xf32>
    %55 = arith.mulf %53, %54 : vector<8x32xf32>
    %56 = vector.broadcast %35 : vector<1x32xf32> to vector<8x32xf32>
    %57 = arith.addf %55, %56 : vector<8x32xf32>
    %58 = arith.truncf %57 : vector<8x32xf32> to vector<8x32xbf16>
    %c0_29 = arith.constant 0 : index
    %c0_30 = arith.constant 0 : index
    %59 = vector.load %arg11[%c0_29, %c0_30] : memref<32x64xbf16, #tpu.memory_space<vmem>>, vector<32x64xbf16>
    %cst_31 = arith.constant dense<0.000000e+00> : vector<8x64xf32>
    %60 = tpu.matmul %58, %59, %cst_31 {dimension_numbers = #tpu.dot_dimension_numbers<[1], [0], [0], [1], [0, 0, 1, 1], [], []>} : vector<8x32xbf16>, vector<32x64xbf16>, vector<8x64xf32> -> vector<8x64xf32>
    %c0_32 = arith.constant 0 : index
    %c0_33 = arith.constant 0 : index
    %61 = vector.load %arg12[%c0_32, %c0_33] : memref<1x64xf32, #tpu.memory_space<vmem>>, vector<1x64xf32>
    %62 = vector.broadcast %61 : vector<1x64xf32> to vector<8x64xf32>
    %63 = arith.addf %60, %62 : vector<8x64xf32>
    %cst_34 = arith.constant 0.000000e+00 : f32
    %64 = vector.broadcast %cst_34 : f32 to vector<8x64xf32>
    %65 = arith.maximumf %63, %64 : vector<8x64xf32>
    %66 = arith.truncf %65 : vector<8x64xf32> to vector<8x64xbf16>
    %c0_35 = arith.constant 0 : index
    %c0_36 = arith.constant 0 : index
    %67 = vector.load %arg13[%c0_35, %c0_36] : memref<64x32xbf16, #tpu.memory_space<vmem>>, vector<64x32xbf16>
    %cst_37 = arith.constant dense<0.000000e+00> : vector<8x32xf32>
    %68 = tpu.matmul %66, %67, %cst_37 {dimension_numbers = #tpu.dot_dimension_numbers<[1], [0], [0], [1], [0, 0, 1, 1], [], []>} : vector<8x64xbf16>, vector<64x32xbf16>, vector<8x32xf32> -> vector<8x32xf32>
    %c0_38 = arith.constant 0 : index
    %c0_39 = arith.constant 0 : index
    %69 = vector.load %arg14[%c0_38, %c0_39] : memref<1x32xf32, #tpu.memory_space<vmem>>, vector<1x32xf32>
    %70 = vector.broadcast %69 : vector<1x32xf32> to vector<8x32xf32>
    %71 = arith.addf %68, %70 : vector<8x32xf32>
    %72 = arith.addf %57, %71 : vector<8x32xf32>
    %c0_40 = arith.constant 0 : index
    %c0_41 = arith.constant 0 : index
    %73 = vector.load %arg17[%c0_40, %c0_41] : memref<1x32xf32, #tpu.memory_space<vmem>>, vector<1x32xf32>
    %c0_42 = arith.constant 0 : index
    %c0_43 = arith.constant 0 : index
    %74 = vector.load %arg18[%c0_42, %c0_43] : memref<1x32xf32, #tpu.memory_space<vmem>>, vector<1x32xf32>
    %cst_44 = arith.constant dense<0.000000e+00> : vector<8xf32>
    %75 = vector.multi_reduction <add>, %72, %cst_44 [1] : vector<8x32xf32> to vector<8xf32>
    %76 = vector.shape_cast %75 : vector<8xf32> to vector<8x1xf32>
    %cst_45 = arith.constant 3.200000e+01 : f32
    %77 = vector.broadcast %cst_45 : f32 to vector<8x1xf32>
    %78 = arith.divf %76, %77 : vector<8x1xf32>
    %79 = vector.broadcast %78 : vector<8x1xf32> to vector<8x32xf32>
    %80 = arith.subf %72, %79 : vector<8x32xf32>
    %81 = arith.mulf %80, %80 : vector<8x32xf32>
    %cst_46 = arith.constant dense<0.000000e+00> : vector<8xf32>
    %82 = vector.multi_reduction <add>, %81, %cst_46 [1] : vector<8x32xf32> to vector<8xf32>
    %83 = vector.shape_cast %82 : vector<8xf32> to vector<8x1xf32>
    %cst_47 = arith.constant 3.200000e+01 : f32
    %84 = vector.broadcast %cst_47 : f32 to vector<8x1xf32>
    %85 = arith.divf %83, %84 : vector<8x1xf32>
    %86 = vector.broadcast %78 : vector<8x1xf32> to vector<8x32xf32>
    %87 = arith.subf %72, %86 : vector<8x32xf32>
    %cst_48 = arith.constant 9.99999974E-6 : f32
    %88 = vector.broadcast %cst_48 : f32 to vector<8x1xf32>
    %89 = arith.addf %85, %88 : vector<8x1xf32>
    %90 = math.rsqrt %89 : vector<8x1xf32>
    %91 = vector.broadcast %90 : vector<8x1xf32> to vector<8x32xf32>
    %92 = arith.mulf %87, %91 : vector<8x32xf32>
    %93 = vector.broadcast %73 : vector<1x32xf32> to vector<8x32xf32>
    %94 = arith.mulf %92, %93 : vector<8x32xf32>
    %95 = vector.broadcast %74 : vector<1x32xf32> to vector<8x32xf32>
    %96 = arith.addf %94, %95 : vector<8x32xf32>
    %97 = arith.truncf %96 : vector<8x32xf32> to vector<8x32xbf16>
    %c0_49 = arith.constant 0 : index
    %c0_50 = arith.constant 0 : index
    %c0_51 = arith.constant 0 : index
    %98 = vector.load %arg19[%c0_49, %c0_50, %c0_51] : memref<1x8x32xbf16, #tpu.memory_space<vmem>>, vector<1x8x32xbf16>
    %99 = vector.shape_cast %98 : vector<1x8x32xbf16> to vector<8x32xbf16>
    %100 = vector.shape_cast %97 : vector<8x32xbf16> to vector<1x8x32xbf16>
    tpu.vector_store %arg19[%c0_49, %c0_50, %c0_51], %100 {strides = array<i32>} : memref<1x8x32xbf16, #tpu.memory_space<vmem>>, vector<1x8x32xbf16>,
    return
  }
  func.func @transform_0(%arg0: i32, %arg1: i32) -> (i32, i32, i32) {
    %c0_i32 = arith.constant 0 : i32
    %c0_i32_0 = arith.constant 0 : i32
    %c0_i32_1 = arith.constant 0 : i32
    return %arg0, %c0_i32, %c0_i32_0 : i32, i32, i32
  }
  func.func @transform_1(%arg0: i32, %arg1: i32) -> (i32, i32) {
    %c0_i32 = arith.constant 0 : i32
    %c0_i32_0 = arith.constant 0 : i32
    %c0_i32_1 = arith.constant 0 : i32
    return %c0_i32, %c0_i32_0 : i32, i32
  }
  func.func @transform_2(%arg0: i32, %arg1: i32) -> (i32, i32) {
    %c0_i32 = arith.constant 0 : i32
    %c0_i32_0 = arith.constant 0 : i32
    %c0_i32_1 = arith.constant 0 : i32
    return %c0_i32, %c0_i32_0 : i32, i32
  }
  func.func @transform_3(%arg0: i32, %arg1: i32) -> (i32, i32) {
    %c0_i32 = arith.constant 0 : i32
    %c0_i32_0 = arith.constant 0 : i32
    %c0_i32_1 = arith.constant 0 : i32
    return %c0_i32, %c0_i32_0 : i32, i32
  }
  func.func @transform_4(%arg0: i32, %arg1: i32) -> (i32, i32) {
    %c0_i32 = arith.constant 0 : i32
    %c0_i32_0 = arith.constant 0 : i32
    %c0_i32_1 = arith.constant 0 : i32
    return %c0_i32, %c0_i32_0 : i32, i32
  }
  func.func @transform_5(%arg0: i32, %arg1: i32) -> (i32, i32) {
    %c0_i32 = arith.constant 0 : i32
    %c0_i32_0 = arith.constant 0 : i32
    %c0_i32_1 = arith.constant 0 : i32
    return %c0_i32, %c0_i32_0 : i32, i32
  }
  func.func @transform_6(%arg0: i32, %arg1: i32) -> (i32, i32) {
    %c0_i32 = arith.constant 0 : i32
    %c0_i32_0 = arith.constant 0 : i32
    %c0_i32_1 = arith.constant 0 : i32
    return %c0_i32, %c0_i32_0 : i32, i32
  }
  func.func @transform_7(%arg0: i32, %arg1: i32) -> (i32, i32, i32) {
    %c0_i32 = arith.constant 0 : i32
    %c0_i32_0 = arith.constant 0 : i32
    %c0_i32_1 = arith.constant 0 : i32
    %c0_i32_2 = arith.constant 0 : i32
    return %c0_i32, %c0_i32_0, %c0_i32_1 : i32, i32, i32
  }
  func.func @transform_8(%arg0: i32, %arg1: i32) -> (i32, i32) {
    %c0_i32 = arith.constant 0 : i32
    %c0_i32_0 = arith.constant 0 : i32
    %c0_i32_1 = arith.constant 0 : i32
    return %c0_i32, %c0_i32_0 : i32, i32
  }
  func.func @transform_9(%arg0: i32, %arg1: i32) -> (i32, i32) {
    %c0_i32 = arith.constant 0 : i32
    %c0_i32_0 = arith.constant 0 : i32
    %c0_i32_1 = arith.constant 0 : i32
    return %c0_i32, %c0_i32_0 : i32, i32
  }
  func.func @transform_10(%arg0: i32, %arg1: i32) -> (i32, i32) {
    %c0_i32 = arith.constant 0 : i32
    %c0_i32_0 = arith.constant 0 : i32
    %c0_i32_1 = arith.constant 0 : i32
    return %c0_i32, %c0_i32_0 : i32, i32
  }
  func.func @transform_11(%arg0: i32, %arg1: i32) -> (i32, i32) {
    %c0_i32 = arith.constant 0 : i32
    %c0_i32_0 = arith.constant 0 : i32
    %c0_i32_1 = arith.constant 0 : i32
    return %c0_i32, %c0_i32_0 : i32, i32
  }
  func.func @transform_12(%arg0: i32, %arg1: i32) -> (i32, i32) {
    %c0_i32 = arith.constant 0 : i32
    %c0_i32_0 = arith.constant 0 : i32
    %c0_i32_1 = arith.constant 0 : i32
    return %c0_i32, %c0_i32_0 : i32, i32
  }
  func.func @transform_13(%arg0: i32, %arg1: i32) -> (i32, i32) {
    %c0_i32 = arith.constant 0 : i32
    %c0_i32_0 = arith.constant 0 : i32
    %c0_i32_1 = arith.constant 0 : i32
    return %c0_i32, %c0_i32_0 : i32, i32
  }
  func.func @transform_14(%arg0: i32, %arg1: i32) -> (i32, i32) {
    %c0_i32 = arith.constant 0 : i32
    %c0_i32_0 = arith.constant 0 : i32
    %c0_i32_1 = arith.constant 0 : i32
    return %c0_i32, %c0_i32_0 : i32, i32
  }
  func.func @transform_15(%arg0: i32, %arg1: i32) -> (i32, i32) {
    %c0_i32 = arith.constant 0 : i32
    %c0_i32_0 = arith.constant 0 : i32
    %c0_i32_1 = arith.constant 0 : i32
    return %c0_i32, %c0_i32_0 : i32, i32
  }
  func.func @transform_16(%arg0: i32, %arg1: i32) -> (i32, i32) {
    %c0_i32 = arith.constant 0 : i32
    %c0_i32_0 = arith.constant 0 : i32
    %c0_i32_1 = arith.constant 0 : i32
    return %c0_i32, %c0_i32_0 : i32, i32
  }
  func.func @transform_17(%arg0: i32, %arg1: i32) -> (i32, i32, i32) {
    %c0_i32 = arith.constant 0 : i32
    %c0_i32_0 = arith.constant 0 : i32
    return %arg0, %arg1, %c0_i32 : i32, i32, i32
  }
}

</mosaic_0001>

<bundles_post_ra>
// kernel: encoder_forward.3
= control target key start
LH: loop header
LB: loop body
LE: loop exit
PB: predicated region body
PF: predicated region fallthrough
CT: control target
= control target key end

     0   :  { %s2696_s0 = inlined_call_operand.vmem [shape: bf16[2,8,32], index: 0, kind: input, shape index: {}]   ;;  %s2697_s1 = inlined_call_operand.vmem [shape: bf16[32,32], index: 1, kind: input, shape index: {}]   ;;  %s2698_s2 = inlined_call_operand.hbm [shape: f32[1,32], index: 2, kind: input, shape index: {}]   ;;  %s2699_s3 = inlined_call_operand.vmem [shape: bf16[32,32], index: 3, kind: input, shape index: {}]   ;;  %s2700_s4 = inlined_call_operand.hbm [shape: f32[1,32], index: 4, kind: input, shape index: {}]   ;;  %s2701_s5 = inlined_call_operand.vmem [shape: bf16[32,32], index: 5, kind: input, shape index: {}]   ;;  %s2702_s6 = inlined_call_operand.hbm [shape: f32[1,32], index: 6, kind: input, shape index: {}]   ;;  %s2703_s7 = inlined_call_operand.vmem [shape: bf16[4,8,32], index: 7, kind: input, shape index: {}]   ;;  %s2704_s8 = inlined_call_operand.hbm [shape: f32[1,32], index: 8, kind: input, shape index: {}]   ;;  %s2705_s9 = inlined_call_operand.hbm [shape: bf16[32,64], index: 9, kind: input, shape index: {}]   ;;  %s2706_s10 = inlined_call_operand.hbm [shape: f32[1,64], index: 10, kind: input, shape index: {}]   ;;  %s2707_s11 = inlined_call_operand.vmem [shape: bf16[64,32], index: 11, kind: input, shape index: {}]   ;;  %s2708_s12 = inlined_call_operand.hbm [shape: f32[1,32], index: 12, kind: input, shape index: {}]   ;;  %s2709_s13 = inlined_call_operand.hbm [shape: f32[1,32], index: 13, kind: input, shape index: {}]   ;;  %s2710_s14 = inlined_call_operand.hbm [shape: f32[1,32], index: 14, kind: input, shape index: {}]   ;;  %s2711_s15 = inlined_call_operand.hbm [shape: f32[1,32], index: 15, kind: input, shape index: {}]   ;;  %s2712_s16 = inlined_call_operand.hbm [shape: f32[1,32], index: 16, kind: input, shape index: {}]   ;;  %s2713_s17 = inlined_call_operand.vmem [shape: f32[1,32], index: 17, kind: input, shape index: {}]   ;;  %s2714_s18 = inlined_call_operand.vmem [shape: f32[1,32], index: 18, kind: input, shape index: {}]   ;;  %s2715_s19 = inlined_call_operand.vmem [shape: bf16[2,8,32], index: 19, kind: output, shape index: {}]  }
   0x1   :  { %2719 = sst [smem:[#allocation29_spill]] %s2696_s0 }
   0x2   :  { %2720 = sst [smem:[#allocation30_spill]] %s2697_s1 }
   0x3   :  { %2721 = sst [smem:[#allocation31_spill]] %s2698_s2 }
   0x4   :  { %2722 = sst [smem:[#allocation32_spill]] %s2699_s3 }
   0x5   :  { %2723 = sst [smem:[#allocation33_spill]] %s2700_s4 }
   0x6   :  { %2724 = sst [smem:[#allocation34_spill]] %s2702_s6 }
   0x7   :  { %2725 = sst [smem:[#allocation35_spill]] %s2704_s8 }
   0x8   :  { %2726 = sst [smem:[#allocation36_spill]] %s2705_s9 }
   0x9   :  { %2727 = sst [smem:[#allocation37_spill]] %s2706_s10 }
   0xa   :  { %2728 = sst [smem:[#allocation38_spill]] %s2715_s19 }
   0xb   :  { %24 = vsyncpa [#allocation6], 0 }
   0xc   :  { %25 = vsyncpa [#allocation8], 0 }
   0xd   :  { %26 = vsyncpa [#allocation11], 0 }
   0xe   :  { %27 = vsyncpa [#allocation14], 0 }
   0xf   :  { %28 = vsyncpa [#allocation17], 0 }
  0x10   :  { %29 = vsyncpa [#allocation20], 0  ;;  %s2427_s0 = smov 0   ;;  %s2429_s30 = smov 0  }
  0x11   :  { %s2431_s20 = smov 0  }
  0x12 LB: > { %2729 = sst [smem:[#allocation28_spill]] %s2308_s20  ;;  %s1647_s2 = sadd.s32 4294967295, %s2308_s20   ;;  %s2308_s20 = sphi %s2431_s20, %s35_s20   ;;  %s2304_s30 = sphi %s2429_s30, %s2745_s30   ;;  %s2300_s0 = sphi %s2427_s0, %s2744_s0  }
  0x13   : > { %s2730_s4 = sld [smem:[#allocation33_spill]]  ;;  %p1649_p0 = scmp.ge.s32.totalorder %s2308_s20, 1 }
  0x14   : > { %p484_p1 = scmp.lt.s32.totalorder %s2308_s20, 3  ;;  %p2448_p2 = scmp.eq.s32.totalorder %s1647_s2, 0 }
  0x15   : > { %s2310_s25 = smov [#allocation7]   ;;  %s2733_s8 = sld [smem:[#allocation35_spill]] }
  0x16   : > { %p2452_p3 = pnand %p1649_p0, %p484_p1  ;;  %s516_s3 = sshll.u32 %s2310_s25, 4  ;;  %s517_s3 = int_to_ptr.vmem [resolvable:$true] %s516_s3 }
  0x17   : > { %s2734_s10 = sld [smem:[#allocation37_spill]]  ;;  %s2311_s25 = smov [#allocation10]  }
  0x18   : > { %p1799_p4 = pneg %p2452_p3  ;;  %s2312_s26 = smov [#allocation13]  }
  0x19   : > { %s514_s22 = sshll.u32 %s2730_s4, 4  ;;  %s546_s4 = sshll.u32 %s2311_s25, 4  ;;  %s515_s22 = int_to_ptr.hbm [resolvable:$true] %s514_s22  ;;  %s547_s4 = int_to_ptr.vmem [resolvable:$true] %s546_s4 }
  0x1a   : > { %p2466_p5 = pnand %p2448_p2, %p1799_p4  ;;  %s572_s27 = sshll.u32 %s2312_s26, 4  ;;  %s573_s27 = int_to_ptr.vmem [resolvable:$true] %s572_s27 }
  0x1b   : > { %s544_s28 = sshll.u32 %s2733_s8, 4  ;;  %s597_s8 = sshll.u32 %s2709_s13, 4  ;;  %s545_s28 = int_to_ptr.hbm [resolvable:$true] %s544_s28  ;;  %s598_s8 = int_to_ptr.hbm [resolvable:$true] %s597_s8 }
  0x1c   : > { %1805 = dma.hbm_to_vmem [thread:$0]  (!%p2466_p5), %s515_s22, 16, %s517_s3, [#allocation8]  }
  0x1d   : > { %s570_s1 = sshll.u32 %s2734_s10, 4  ;;  %s621_s20 = sshll.u32 %s2711_s15, 4  ;;  %s571_s1 = int_to_ptr.hbm [resolvable:$true] %s570_s1  ;;  %s622_s20 = int_to_ptr.hbm [resolvable:$true] %s621_s20 }
  0x1e   : > { %1811 = dma.hbm_to_vmem [thread:$0]  (!%p2466_p5), %s545_s28, 16, %s547_s4, [#allocation11]  }
  0x1f   : > { %1817 = dma.hbm_to_vmem [thread:$0]  (!%p2466_p5), %s571_s1, 16, %s573_s27, [#allocation14]  }
  0x20   : > { %s2313_s19 = smov [#allocation16]   ;;  %s2314_s4 = smov [#allocation19]  }
  0x21   : > { %s599_s22 = sshll.u32 %s2313_s19, 4  ;;  %s623_s3 = sshll.u32 %s2314_s4, 4  ;;  %s600_s22 = int_to_ptr.vmem [resolvable:$true] %s599_s22  ;;  %s624_s3 = int_to_ptr.vmem [resolvable:$true] %s623_s3 }
  0x22   : > { %1823 = dma.hbm_to_vmem [thread:$0]  (!%p2466_p5), %s598_s8, 16, %s600_s22, [#allocation17]  }
  0x23   : > { %1829 = dma.hbm_to_vmem [thread:$0]  (!%p2466_p5), %s622_s20, 16, %s624_s3, [#allocation20]  }
  0x24   : > { %s47_s28 = sadd.s32 1, %s2304_s30  ;;  %s2736_s1 = sld [smem:[#allocation31_spill]] }
  0x25   : > { %p49_p6 = scmp.ge.s32.totalorder %s47_s28, 2  ;;  %s2737_s6 = sld [smem:[#allocation34_spill]] }
  0x26   : > { %s2315_s8 = smov [#allocation5]   ;;  %s2316_s20 = smov [#allocation9]  }
  0x27   : > { %s2747_s28 = smov (%p49_p6, %s47_s28), 0  ;;  %s501_s25 = sshll.u32 %s2315_s8, 4  ;;  %s502_s25 = int_to_ptr.vmem [resolvable:$true] %s501_s25 }
  0x28   : > { %s531_s22 = sshll.u32 %s2316_s20, 4  ;;  %s2738_s9 = sld [smem:[#allocation36_spill]]  ;;  %s532_s22 = int_to_ptr.vmem [resolvable:$true] %s531_s22 }
  0x29   : > { %s2317_s29 = smov [#allocation12]   ;;  %s585_s8 = sshll.u32 %s2708_s12, 4  ;;  %s586_s8 = int_to_ptr.hbm [resolvable:$true] %s585_s8 }
  0x2a   : > { %s499_s27 = sshll.u32 %s2736_s1, 4  ;;  %s557_s1 = sshll.u32 %s2317_s29, 4  ;;  %s500_s27 = int_to_ptr.hbm [resolvable:$true] %s499_s27  ;;  %s558_s1 = int_to_ptr.vmem [resolvable:$true] %s557_s1 }
  0x2b   : > { %s529_s21 = sshll.u32 %s2737_s6, 4  ;;  %s2320_s20 = smov [#allocation15]   ;;  %s530_s21 = int_to_ptr.hbm [resolvable:$true] %s529_s21 }
  0x2c   : > { %1802 = dma.hbm_to_vmem [thread:$0]  (!%p2466_p5), %s500_s27, 16, %s502_s25, [#allocation6]  }
  0x2d   : > { %1808 = dma.hbm_to_vmem [thread:$0]  (!%p2466_p5), %s530_s21, 16, %s532_s22, [#allocation8]  }
  0x2e   : > { %s555_s26 = sshll.u32 %s2738_s9, 4  ;;  %s2318_s27 = smov 64   ;;  %s556_s26 = int_to_ptr.hbm [resolvable:$true] %s555_s26 }
  0x2f   : > { %s2319_s25 = smov 4   ;;  %s587_s4 = sshll.u32 %s2320_s20, 4  ;;  %s588_s4 = int_to_ptr.vmem [resolvable:$true] %s587_s4 }
  0x30   : > { %1814 = dma.hbm_to_vmem [thread:$0]  (!%p2466_p5), %s556_s26, 256, %s558_s1, [#allocation11], %s2318_s27, %s2318_s27, %s2319_s25  }
  0x31   : > { %s609_s21 = sshll.u32 %s2710_s14, 4  ;;  %s633_s10 = sshll.u32 %s2712_s16, 4  ;;  %s610_s21 = int_to_ptr.hbm [resolvable:$true] %s609_s21  ;;  %s634_s10 = int_to_ptr.hbm [resolvable:$true] %s633_s10 }
  0x32   : > { %1820 = dma.hbm_to_vmem [thread:$0]  (!%p2466_p5), %s586_s8, 16, %s588_s4, [#allocation14]  }
  0x33   : > { %s2321_s19 = smov [#allocation18]   ;;  %s2322_s26 = smov [#allocation21]  }
  0x34   : > { %s611_s9 = sshll.u32 %s2321_s19, 4  ;;  %s635_s1 = sshll.u32 %s2322_s26, 4  ;;  %s612_s9 = int_to_ptr.vmem [resolvable:$true] %s611_s9  ;;  %s636_s1 = int_to_ptr.vmem [resolvable:$true] %s635_s1 }
  0x35   : > { %1826 = dma.hbm_to_vmem [thread:$0]  (!%p2466_p5), %s610_s21, 16, %s612_s9, [#allocation17]  }
  0x36   : > { %1832 = dma.hbm_to_vmem [thread:$0]  (!%p2466_p5), %s634_s10, 16, %s636_s1, [#allocation20]  }
  0x37   : > { %661 = sbr.rel (%p2452_p3) target bundleno = 2086 (0x826), region = 96 }
  0x3c   : > { %2275 = dma.done.wait (%p2448_p2), [#allocation6], 16  }
  0x3d   : > { %2277 = vsyncadd (%p2448_p2), [#allocation6], 4294967280 }
  0x3e   : > { %2279 = dma.done.wait (%p2448_p2), [#allocation8], 32  }
  0x3f   : > { %2281 = vsyncadd (%p2448_p2), [#allocation8], 4294967264 }
  0x40   : > { %2283 = dma.done.wait (%p2448_p2), [#allocation11], 272  }
  0x41   : > { %2285 = vsyncadd (%p2448_p2), [#allocation11], 4294967024 }
  0x42   : > { %2287 = dma.done.wait (%p2448_p2), [#allocation14], 32  }
  0x43   : > { %2289 = vsyncadd (%p2448_p2), [#allocation14], 4294967264 }
  0x44   : > { %2291 = dma.done.wait (%p2448_p2), [#allocation17], 32  }
  0x45   : > { %2293 = vsyncadd (%p2448_p2), [#allocation17], 4294967264 }
  0x46   : > { %2295 = dma.done.wait (%p2448_p2), [#allocation20], 32  }
  0x47   : > { %2297 = vsyncadd (%p2448_p2), [#allocation20], 4294967264  ;;  %p769_p7 = scmp.lt.s32.totalorder %s2300_s0, 1  ;;  %s2739_s24 = sld [smem:[#allocation32_spill]]  ;;  %vm806_vm0 = vcmask 261120   ;;  %vm824_vm1 = vcmask 60416  }
  0x48   : > { %s2740_s27 = sld [smem:[#allocation30_spill]]  ;;  %v1896_v5 = vld [vmem:[#allocation7] ss:$0 sm:$0xff]  ;;  %v1897_v6 = vld [vmem:[#allocation5] ss:$0 sm:$0xff]  ;;  %s2323_s19 = smov 120  }
  0x49   : > { %s2749_s0 = smov (!%p769_p7, %s2300_s0), 1  ;;  %s2741_s29 = sld [smem:[#allocation29_spill]]  ;;  %vm961_vm2 = vcmask 64512   ;;  %v1748_v18 = vld [vmem:[%s2701_s5 + $0x8] sm:$0xff]  ;;  %v1747_v19 = vld [vmem:[%s2701_s5] sm:$0xff]  ;;  %vm1089_vm3 = vcmask 1043456  }
  0x4a   : > { %s1674_s25 = sshll.u32 %s2749_s0, 2  ;;  %s2324_s26 = smov 104   ;;  %919 = vmatpush.bf16.msra.mxu2 %v1748_v18  ;;  %v1898_v38 = vld [vmem:[#allocation9] ss:$0 sm:$0xff]  ;;  %vm1379_vm8 = vcmask 523264   ;;  %vm1462_vm15 = vcmask 257024  }
  0x4b   : > { %s2325_s1 = smov 112  }
  0x4d   : > { %v1746_v0 = vld [vmem:[%s2739_s24 + $0x8] sm:$0xff]  ;;  %v1745_v2 = vld [vmem:[%s2739_s24] sm:$0xff] }
  0x4e   : > { %v1744_v1 = vld [vmem:[%s2740_s27 + $0x8] sm:$0xff]  ;;  %868 = vmatpush.bf16.msra.mxu1 %v1746_v0  ;;  %v1743_v3 = vld [vmem:[%s2740_s27] sm:$0xff]  ;;  %920 = vmatpush.bf16.msra.mxu2 %v1747_v19 }
  0x4f   : > { %816 = vmatpush.bf16.msra.mxu0 %v1744_v1  ;;  %s2567_s10 = scalar_lea.vmem %s2741_s29, %s1674_s25 }
  0x50   : > { %v785_v4 = vld [vmem:[%s2567_s10] sm:$0xf] }
  0x51   : > { %1702 = vmatmul.msk.bf16.vlgmr.msra.gmra.mxu2 %vm806_vm0, %v785_v4 }
  0x52   : > { %869 = vmatpush.bf16.msra.mxu1 %v1745_v2 }
  0x53   : > { %817 = vmatpush.bf16.msra.mxu0 %v1743_v3 }
  0x55   : > { %1693 = vmatmul.msk.bf16.vlgmr.msra.gmra.mxu1 %vm806_vm0, %v785_v4 }
  0x56   : > { %1684 = vmatmul.msk.bf16.vlgmr.msra.gmra.mxu0 %vm806_vm0, %v785_v4 }
  0xd2   : > { %v871_v7 = vpop.f32.mrf.mxu1 }
  0xd3   : > { %v819_v8 = vpop.f32.mrf.mxu0  ;;  %v872_v9 = vadd.f32 %v1896_v5, %v871_v7 }
  0xd4   : > { %v820_v10 = vadd.f32 %v1897_v6, %v819_v8  ;;  %v922_v39 = vpop.f32.mrf.mxu2 }
  0xd5   : > { %v875_v11 = vpack.c.bf16 %v872_v9, %v872_v9  ;;  %v923_v40 = vadd.f32 %v1898_v38, %v922_v39 }
  0xd6   : > { %v823_v12 = vpack.c.bf16 %v820_v10, %v820_v10 }
  0xd7   : > { %876 = vst.msk [vmem:[#allocation3] sm:$0xf] %vm824_vm1, %v875_v11  ;;  %878 = vrot.lane.b32.xlu1 %v875_v11, %s2323_s19  ;;  %888 = vrot.lane.b32.xlu0 %v875_v11, %s2324_s26  ;;  %v926_v41 = vpack.c.bf16 %v923_v40, %v923_v40  ;;  %v1168_v40 = vld [vmem:[%s2703_s7 + $0x4] sm:$0xf] }
  0xd8   : > { %825 = vst.msk [vmem:[#allocation2] sm:$0xf] %vm824_vm1, %v823_v12  ;;  %827 = vrot.lane.b32.xlu2 %v823_v12, %s2323_s19 }
  0xd9   : > { %927 = vst.msk [vmem:[#allocation4] sm:$0xf] %vm824_vm1, %v926_v41 }
  0xda   : > { %v873_v13 = vpop.f32.mrf.mxu1 }
  0xdb   : > { %v821_v14 = vpop.f32.mrf.mxu0 }
  0xdc   : > { %v924_v42 = vpop.f32.mrf.mxu2 }
  0xdd   : > { %v1170_v42 = vld [vmem:[%s2703_s7 + $0xc] sm:$0xf] }
  0xde   : > { %v953_v15 = vld [vmem:[#allocation3] sm:$0xf] }
  0xdf   : > { %883 = vrot.lane.b32.xlu1 %v875_v11, %s2325_s1  ;;  %837 = vrot.lane.b32.xlu0 %v823_v12, %s2324_s26  ;;  %v966_v16 = vsel %vm961_vm2, %v953_v15, 0  ;;  %v949_v17 = vld [vmem:[#allocation2] sm:$0xf] }
  0xe0   : > { %975 = vmatpush.bf16.xpose.msra.mxu3 %v966_v16  ;;  %832 = vrot.lane.b32.xlu2 %v823_v12, %s2325_s1  ;;  %v957_v43 = vld [vmem:[#allocation4] sm:$0xf] }
  0xe1   : > { %v1091_v44 = vsel %vm1089_vm3, %v957_v43, 0  ;;  %v1232_v43 = vsel %vm1089_vm3, %v1170_v42, 0 }
  0xe7   : > { %1703 = vmatmul.msk.bf16.vlgmr.msra.gmra.mxu3 %vm961_vm2, %v949_v17 }
  0xe8   : > { %1100 = vmatpush.bf16.msrb.mxu3 %v1091_v44  ;;  %v1169_v44 = vld [vmem:[%s2703_s7 + $0x8] sm:$0xf] }
 0x132   : > { %v828_v20 = vpop.permute.xlu2 %827 }
 0x133   : > { %831 = vst.msk [vmem:[#allocation2 + $0x4] sm:$0xf] %vm824_vm1, %v828_v20 }
 0x13a   : > { %v833_v21 = vpop.permute.xlu2 %832  ;;  %v950_v30 = vld [vmem:[#allocation2 + $0x4] sm:$0xf] }
 0x13b   : > { %836 = vst.msk [vmem:[#allocation2 + $0x8] sm:$0xf] %vm824_vm1, %v833_v21  ;;  %v1167_v21 = vld [vmem:[%s2703_s7] sm:$0xf] }
 0x142   : > { %v951_v34 = vld [vmem:[#allocation2 + $0x8] sm:$0xf] }
 0x149   : > { %v879_v22 = vpop.permute.xlu1 %878  ;;  %v889_v23 = vpop.permute.xlu0 %888 }
 0x14a   : > { %882 = vst.msk [vmem:[#allocation3 + $0x4] sm:$0xf] %vm824_vm1, %v879_v22  ;;  %v1175_v22 = vsel %vm1089_vm3, %v1167_v21, 0 }
 0x14b   : > { %892 = vst.msk [vmem:[#allocation3 + $0xc] sm:$0xf] %vm824_vm1, %v889_v23  ;;  %1184 = vmatpush.bf16.msra.mxu3 %v1175_v22 }
 0x151   : > { %v884_v24 = vpop.permute.xlu1 %883  ;;  %v838_v25 = vpop.permute.xlu0 %837  ;;  %v954_v26 = vld [vmem:[#allocation3 + $0x4] sm:$0xf] }
 0x152   : > { %887 = vst.msk [vmem:[#allocation3 + $0x8] sm:$0xf] %vm824_vm1, %v884_v24  ;;  %v985_v27 = vsel %vm961_vm2, %v954_v26, 0  ;;  %v956_v28 = vld [vmem:[#allocation3 + $0xc] sm:$0xf] }
 0x153   : > { %841 = vst.msk [vmem:[#allocation2 + $0xc] sm:$0xf] %vm824_vm1, %v838_v25  ;;  %994 = vmatpush.bf16.xpose.msrb.mxu0 %v985_v27  ;;  %v1023_v29 = vsel %vm961_vm2, %v956_v28, 0 }
 0x154   : > { %1032 = vmatpush.bf16.xpose.msrb.mxu2 %v1023_v29 }
 0x159   : > { %v955_v31 = vld [vmem:[#allocation3 + $0x8] sm:$0xf] }
 0x15a   : > { %1704 = vmatmul.msk.bf16.vlgmr.msrb.gmra.mxu0 %vm961_vm2, %v950_v30  ;;  %v952_v32 = vld [vmem:[#allocation2 + $0xc] sm:$0xf]  ;;  %v1004_v33 = vsel %vm961_vm2, %v955_v31, 0 }
 0x15b   : > { %1706 = vmatmul.msk.bf16.vlgmr.msrb.gmra.mxu2 %vm961_vm2, %v952_v32  ;;  %1013 = vmatpush.bf16.xpose.msrb.mxu1 %v1004_v33 }
 0x162   : > { %1705 = vmatmul.msk.bf16.vlgmr.msrb.gmra.mxu1 %vm961_vm2, %v951_v34 }
 0x16a   : > { %v977_v35 = vpop.f32.mrf.mxu3 }
 0x16b   : > { %v1038_v36 = vsel %vm961_vm2, %v977_v35, -inf }
 0x16c   : > { %1039 = vmax.xlane.f32.xlu0 %v1038_v36 }
 0x172   : > { %v979_v37 = vpop.f32.mrf.mxu3 }
 0x1d7   : > { %v996_v45 = vpop.f32.mrf.mxu0 }
 0x1d8   : > { %v1041_v46 = vsel %vm961_vm2, %v996_v45, -inf }
 0x1d9   : > { %1042 = vmax.xlane.f32.xlu2 %v1041_v46 }
 0x1de   : > { %v1034_v47 = vpop.f32.mrf.mxu2 }
 0x1df   : > { %v998_v48 = vpop.f32.mrf.mxu0  ;;  %v1015_v49 = vpop.f32.mrf.mxu1  ;;  %v1047_v50 = vsel %vm961_vm2, %v1034_v47, -inf }
 0x1e0   : > { %1048 = vmax.xlane.f32.xlu1 %v1047_v50  ;;  %v1040_v51 = vpop.xlane.xlu0 %1039  ;;  %v1044_v52 = vsel %vm961_vm2, %v1015_v49, -inf }
 0x1e1   : > { %v1050_v53 = vsub.f32 %v977_v35, %v1040_v51  ;;  %1045 = vmax.xlane.f32.xlu2 %v1044_v52 }
 0x1e3   : > { %v1054_v54 = vmul.f32 1.442695, %v1050_v53 }
 0x1e5   : > { %1908 = vpow2.f32 %v1054_v54 }
 0x1e6   : > { %v1036_v55 = vpop.f32.mrf.mxu2 }
 0x1e7   : > { %v1017_v56 = vpop.f32.mrf.mxu1 }
 0x1eb   : > { %v1909_v57 = vpop.eup %1908 }
 0x1ec   : > { %v1062_v58 = vsel %vm961_vm2, %v1909_v57, 0.0 }
 0x1ed   : > { %1063 = vadd.xlane.f32.xlu0 %v1062_v58 }
 0x1f9   : > { %939 = vrot.lane.b32.xlu1 %v926_v41, %s2324_s26 }
 0x201   : > { %929 = vrot.lane.b32.xlu0 %v926_v41, %s2323_s19  ;;  %s2742_s19 = sld [smem:[#allocation38_spill]] }
 0x24c   : > { %v1043_v59 = vpop.xlane.xlu2 %1042 }
 0x24d   : > { %v1051_v60 = vsub.f32 %v996_v45, %v1043_v59  ;;  %v1213_v45 = vsel %vm1089_vm3, %v1169_v44, 0  ;;  %v1752_v44 = vld [vmem:[%s2707_s11 + $0x8] sm:$0xff] }
 0x24f   : > { %v1056_v61 = vmul.f32 1.442695, %v1051_v60 }
 0x251   : > { %1910 = vpow2.f32 %v1056_v61 }
 0x253   : > { %v1049_v62 = vpop.xlane.xlu1 %1048 }
 0x254   : > { %v1053_v63 = vsub.f32 %v1034_v47, %v1049_v62  ;;  %v1046_v0 = vpop.xlane.xlu2 %1045 }
 0x255   : > { %v1052_v1 = vsub.f32 %v1015_v49, %v1046_v0  ;;  %v1262_v0 = vld [vmem:[%s2567_s10] sm:$0xf]  ;;  %s779_s10 = scalar_lea.vmem %s2742_s19, %s1674_s25 }
 0x256   : > { %v1060_v2 = vmul.f32 1.442695, %v1053_v63 }
 0x257   : > { %v1911_v3 = vpop.eup %1910  ;;  %v1058_v4 = vmul.f32 1.442695, %v1052_v1 }
 0x258   : > { %1912 = vpow2.f32 %v1060_v2  ;;  %v1065_v5 = vsel %vm961_vm2, %v1911_v3, 0.0 }
 0x259   : > { %1914 = vpow2.f32 %v1058_v4  ;;  %1066 = vadd.xlane.f32.xlu2 %v1065_v5  ;;  %v1263_v5 = vunpack.c.l.bf16 %v1262_v0 }
 0x25e   : > { %v1913_v6 = vpop.eup %1912 }
 0x25f   : > { %v1915_v7 = vpop.eup %1914  ;;  %v1071_v10 = vsel %vm961_vm2, %v1913_v6, 0.0 }
 0x260   : > { %v1064_v8 = vpop.xlane.xlu0 %1063  ;;  %v1068_v9 = vsel %vm961_vm2, %v1915_v7, 0.0 }
 0x261   : > { %1916 = vrcp.f32 %v1064_v8  ;;  %1069 = vadd.xlane.f32.xlu1 %v1068_v9  ;;  %1072 = vadd.xlane.f32.xlu2 %v1071_v10 }
 0x267   : > { %v1917_v11 = vpop.eup %1916 }
 0x268   : > { %v1078_v12 = vmul.f32 %v1917_v11, %v1909_v57 }
 0x26a   : > { %v1082_v13 = vpack.c.bf16 %v1078_v12, %v1078_v12  ;;  %v2326_v12 = vmov 32.0  }
 0x26b   : > { %v940_v14 = vpop.permute.xlu1 %939 }
 0x26c   : > { %943 = vst.msk [vmem:[#allocation4 + $0xc] sm:$0xf] %vm824_vm1, %v940_v14  ;;  %1707 = vmatmul.msk.bf16.vlgmr.msrb.gmra.mxu3 %vm961_vm2, %v1082_v13 }
 0x273   : > { %v930_v15 = vpop.permute.xlu0 %929  ;;  %v960_v16 = vld [vmem:[#allocation4 + $0xc] sm:$0xf] }
 0x274   : > { %933 = vst.msk [vmem:[#allocation4 + $0x4] sm:$0xf] %vm824_vm1, %v930_v15  ;;  %v1148_v17 = vsel %vm1089_vm3, %v960_v16, 0 }
 0x275   : > { %1157 = vmatpush.bf16.msra.mxu2 %v1148_v17 }
 0x279   : > { %934 = vrot.lane.b32.xlu2 %v926_v41, %s2325_s1  ;;  %v1194_v41 = vsel %vm1089_vm3, %v1168_v40, 0  ;;  %1241 = vmatpush.bf16.msrb.mxu2 %v1232_v43 }
 0x27b   : > { %v958_v18 = vld [vmem:[#allocation4 + $0x4] sm:$0xf] }
 0x27c   : > { %v1110_v19 = vsel %vm1089_vm3, %v958_v18, 0 }
 0x27d   : > { %1119 = vmatpush.bf16.msra.mxu0 %v1110_v19 }
 0x281   : > { %1203 = vmatpush.bf16.msrb.mxu0 %v1194_v41 }
 0x2cc   : > { %v1067_v20 = vpop.xlane.xlu2 %1066 }
 0x2cd   : > { %1918 = vrcp.f32 %v1067_v20 }
 0x2d3   : > { %v1919_v23 = vpop.eup %1918 }
 0x2d4   : > { %v1079_v24 = vmul.f32 %v1919_v23, %v1911_v3  ;;  %v1073_v25 = vpop.xlane.xlu2 %1072  ;;  %v1070_v27 = vpop.xlane.xlu1 %1069  ;;  %v1899_v3 = vld [vmem:[#allocation10] ss:$0 sm:$0xff] }
 0x2d5   : > { %1920 = vrcp.f32 %v1073_v25  ;;  %v1749_v25 = vld [vmem:[#allocation12] sm:$0xff] }
 0x2d6   : > { %v1083_v26 = vpack.c.bf16 %v1079_v24, %v1079_v24  ;;  %1922 = vrcp.f32 %v1070_v27  ;;  %v1750_v24 = vld [vmem:[#allocation12 + $0x8] sm:$0xff] }
 0x2d7   : > { %1924 = vrcp.f32 %v2326_v12  ;;  %1334 = vmatpush.bf16.msrb.mxu3 %v1750_v24 }
 0x2d8   : > { %1708 = vmatmul.msk.bf16.vlgmr.msra.gmra.mxu0 %vm961_vm2, %v1083_v26  ;;  %v1754_v26 = vld [vmem:[%s2707_s11 + $0x18] sm:$0xff] }
 0x2d9   : > { %1387 = vmatpush.bf16.msra.mxu0 %v1754_v26 }
 0x2db   : > { %v1921_v28 = vpop.eup %1920  ;;  %1335 = vmatpush.bf16.msrb.mxu3 %v1749_v25 }
 0x2dc   : > { %v1081_v29 = vmul.f32 %v1921_v28, %v1913_v6  ;;  %v935_v30 = vpop.permute.xlu2 %934  ;;  %v1923_v32 = vpop.eup %1922 }
 0x2dd   : > { %938 = vst.msk [vmem:[#allocation4 + $0x8] sm:$0xf] %vm824_vm1, %v935_v30  ;;  %v1080_v33 = vmul.f32 %v1923_v32, %v1915_v7  ;;  %v1925_v13 = vpop.eup %1924 }
 0x2de   : > { %v1085_v31 = vpack.c.bf16 %v1081_v29, %v1081_v29  ;;  %v1271_v14 = vmul.f32 32.0, %v1925_v13  ;;  %vm1275_vm4 = vweird.f32 %v1925_v13  ;;  %v1753_v29 = vld [vmem:[%s2707_s11 + $0x10] sm:$0xff] }
 0x2df   : > { %v1084_v36 = vpack.c.bf16 %v1080_v33, %v1080_v33  ;;  %1388 = vmatpush.bf16.msra.mxu0 %v1753_v29 }
 0x2e0   : > { %1710 = vmatmul.msk.bf16.vlgmr.msra.gmra.mxu2 %vm961_vm2, %v1085_v31  ;;  %v1272_v15 = vsub.f32 1.0, %v1271_v14 }
 0x2e2   : > { %v1273_v16 = vmul.f32 %v1925_v13, %v1272_v15 }
 0x2e3   : > { %1389 = vmatpush.bf16.msra.mxu0 %v1752_v44 }
 0x2e4   : > { %v959_v34 = vld [vmem:[#allocation4 + $0x8] sm:$0xf]  ;;  %v1274_v17 = vadd.f32 %v1925_v13, %v1273_v16 }
 0x2e5   : > { %v1129_v35 = vsel %vm1089_vm3, %v959_v34, 0 }
 0x2e6   : > { %1138 = vmatpush.bf16.msra.mxu1 %v1129_v35  ;;  %v2650_v18 = vsel %vm1275_vm4, %v1925_v13, %v1274_v17 }
 0x2e9   : > { %1709 = vmatmul.msk.bf16.vlgmr.msra.gmra.mxu1 %vm961_vm2, %v1084_v36 }
 0x2ea   : > { %1222 = vmatpush.bf16.msrb.mxu1 %v1213_v45  ;;  %v1751_v45 = vld [vmem:[%s2707_s11] sm:$0xff] }
 0x2eb   : > { %1390 = vmatpush.bf16.msra.mxu0 %v1751_v45 }
 0x2ef   : > { %v1102_v37 = vpop.f32.mrf.mxu3 }
 0x2f0   : > { %v1163_v38 = vpack.c.bf16 %v1102_v37, %v1102_v37  ;;  %v1900_v37 = vld [vmem:[#allocation16] ss:$0 sm:$0xff] }
 0x2f2   : > { %1711 = vmatmul.msk.bf16.vlgmr.msra.gmra.mxu3 %vm961_vm2, %v1163_v38 }
 0x2f7   : > { %v1104_v39 = vpop.f32.mrf.mxu3 }
 0x2f8   : > { %v1901_v39 = vld [vmem:[#allocation18] ss:$0 sm:$0xff] }
 0x355   : > { %v1121_v46 = vpop.f32.mrf.mxu0 }
 0x356   : > { %v1164_v47 = vpack.c.bf16 %v1121_v46, %v1121_v46  ;;  %v1902_v46 = vld [vmem:[#allocation13] ss:$0 sm:$0xff] }
 0x358   : > { %1712 = vmatmul.msk.bf16.vlgmr.msrb.gmra.mxu0 %vm961_vm2, %v1164_v47 }
 0x35d   : > { %v1123_v48 = vpop.f32.mrf.mxu0 }
 0x363   : > { %v1159_v49 = vpop.f32.mrf.mxu2 }
 0x364   : > { %v1166_v50 = vpack.c.bf16 %v1159_v49, %v1159_v49 }
 0x366   : > { %v1140_v51 = vpop.f32.mrf.mxu1  ;;  %1714 = vmatmul.msk.bf16.vlgmr.msrb.gmra.mxu2 %vm961_vm2, %v1166_v50 }
 0x367   : > { %v1165_v52 = vpack.c.bf16 %v1140_v51, %v1140_v51 }
 0x369   : > { %1713 = vmatmul.msk.bf16.vlgmr.msrb.gmra.mxu1 %vm961_vm2, %v1165_v52  ;;  %v1903_v52 = vld [vmem:[#allocation15] ss:$0 sm:$0xff] }
 0x36b   : > { %v1161_v53 = vpop.f32.mrf.mxu2 }
 0x36e   : > { %v1142_v54 = vpop.f32.mrf.mxu1 }
 0x375   : > { %v1186_v55 = vpop.f32.mrf.mxu3 }
 0x376   : > { %v1248_v60 = vsel %vm806_vm0, %v1186_v55, 0.0 }
 0x37d   : > { %v1188_v56 = vpop.f32.mrf.mxu3 }
 0x3d5   : > { %v1205_v57 = vpop.f32.mrf.mxu0 }
 0x3d6   : > { %v1249_v59 = vsel %vm806_vm0, %v1205_v57, 0.0 }
 0x3d7   : > { %v1250_v61 = vadd.f32 %v1249_v59, %v1248_v60 }
 0x3dd   : > { %v1207_v58 = vpop.f32.mrf.mxu0 }
 0x3e6   : > { %v1224_v62 = vpop.f32.mrf.mxu1 }
 0x3e7   : > { %v1251_v63 = vsel %vm806_vm0, %v1224_v62, 0.0 }
 0x3e8   : > { %v1252_v1 = vadd.f32 %v1251_v63, %v1250_v61 }
 0x3e9   : > { %v1243_v2 = vpop.f32.mrf.mxu2 }
 0x3ea   : > { %v1253_v4 = vsel %vm806_vm0, %v1243_v2, 0.0 }
 0x3eb   : > { %v1254_v6 = vadd.f32 %v1253_v4, %v1252_v1 }
 0x3ed   : > { %v1259_v7 = vadd.f32 %v1899_v3, %v1254_v6 }
 0x3ee   : > { %v1226_v8 = vpop.f32.mrf.mxu1 }
 0x3ef   : > { %v1264_v9 = vadd.f32 %v1263_v5, %v1259_v7  ;;  %v1904_v8 = vld [vmem:[#allocation19] ss:$0 sm:$0xff] }
 0x3f1   : > { %v1245_v10 = vpop.f32.mrf.mxu2  ;;  %v1267_v11 = vsel %vm806_vm0, %v1264_v9, 0.0 }
 0x3f2   : > { %1268 = vadd.xlane.f32.xlu0 %v1267_v11  ;;  %v1905_v11 = vld [vmem:[#allocation21] ss:$0 sm:$0xff] }
 0x465   : > { %v1269_v19 = vpop.xlane.xlu0 %1268 }
 0x466   : > { %v1277_v20 = vmul.f32 %v2650_v18, %v1269_v19 }
 0x468   : > { %v1278_v21 = vsub.f32 %v1264_v9, %v1277_v20 }
 0x46a   : > { %v1279_v22 = vmul.f32 %v1278_v21, %v1278_v21 }
 0x46c   : > { %v1280_v23 = vsel %vm806_vm0, %v1279_v22, 0.0 }
 0x46d   : > { %1281 = vadd.xlane.f32.xlu2 %v1280_v23 }
 0x4e0   : > { %v1282_v27 = vpop.xlane.xlu2 %1281 }
 0x4e1   : > { %v1283_v28 = vmul.f32 %v1282_v27, %v2650_v18 }
 0x4e3   : > { %v1284_v30 = vadd.f32 1e-05, %v1283_v28 }
 0x4e5   : > { %1926 = vrsqrt.f32 %v1284_v30  ;;  %vm1291_vm6 = vweird.f32 %v1284_v30 }
 0x4eb   : > { %v1927_v31 = vpop.eup %1926 }
 0x4ec   : > { %v1286_v32 = vmul.f32 %v1927_v31, %v1284_v30  ;;  %vm1292_vm5 = vweird.f32 %v1927_v31  ;;  %v1906_v30 = vld [vmem:[%s2713_s17] ss:$0 sm:$0xff] }
 0x4ed   : > { %vm1293_vm7 = vmor %vm1291_vm6, %vm1292_vm5 }
 0x4ee   : > { %v1287_v33 = vmul.f32 %v1927_v31, %v1286_v32 }
 0x4f0   : > { %v1288_v34 = vmul.f32 0.5, %v1287_v33 }
 0x4f2   : > { %v1289_v35 = vsub.f32 1.5, %v1288_v34 }
 0x4f4   : > { %v1290_v36 = vmul.f32 %v1927_v31, %v1289_v35 }
 0x4f6   : > { %v1294_v38 = vsel %vm1293_vm7, %v1927_v31, %v1290_v36 }
 0x4f7   : > { %v1295_v40 = vmul.f32 %v1294_v38, %v1278_v21 }
 0x4f9   : > { %v1299_v41 = vmul.f32 %v1900_v37, %v1295_v40 }
 0x4fb   : > { %v1303_v42 = vadd.f32 %v1901_v39, %v1299_v41 }
 0x4fd   : > { %v1304_v43 = vpack.c.bf16 %v1303_v42, %v1303_v42 }
 0x4ff   : > { %1723 = vmatmul.msk.bf16.vlgmr.msrb.gmra.mxu3 %vm806_vm0, %v1304_v43 }
 0x582   : > { %v1337_v47 = vpop.f32.mrf.mxu3 }
 0x583   : > { %v1338_v48 = vadd.f32 %v1902_v46, %v1337_v47 }
 0x585   : > { %v1341_v49 = vmax.f32 %v1338_v48, 0.0 }
 0x587   : > { %v1342_v50 = vpack.c.bf16 %v1341_v49, %v1341_v49 }
 0x589   : > { %1740 = vmatmul.msk.bf16.vlgmr.msra.gmra.mxu0 %vm1379_vm8, %v1342_v50 }
 0x58a   : > { %v1339_v51 = vpop.f32.mrf.mxu3 }
 0x606   : > { %v1392_v53 = vpop.f32.mrf.mxu0 }
 0x607   : > { %v1393_v54 = vadd.f32 %v1903_v52, %v1392_v53 }
 0x609   : > { %v1396_v55 = vadd.f32 %v1393_v54, %v1303_v42 }
 0x60b   : > { %v1399_v56 = vsel %vm806_vm0, %v1396_v55, 0.0 }
 0x60c   : > { %1400 = vadd.xlane.f32.xlu1 %v1399_v56 }
 0x60e   : > { %v1394_v57 = vpop.f32.mrf.mxu0 }
 0x67f   : > { %v1401_v58 = vpop.xlane.xlu1 %1400 }
 0x680   : > { %v1402_v59 = vmul.f32 %v1401_v58, %v2650_v18 }
 0x682   : > { %v1403_v60 = vsub.f32 %v1396_v55, %v1402_v59 }
 0x684   : > { %v1404_v61 = vmul.f32 %v1403_v60, %v1403_v60 }
 0x686   : > { %v1405_v62 = vsel %vm806_vm0, %v1404_v61, 0.0 }
 0x687   : > { %1406 = vadd.xlane.f32.xlu0 %v1405_v62 }
 0x6fa   : > { %v1407_v63 = vpop.xlane.xlu0 %1406 }
 0x6fb   : > { %v1408_v0 = vmul.f32 %v1407_v63, %v2650_v18 }
 0x6fd   : > { %v1409_v1 = vadd.f32 1e-05, %v1408_v0 }
 0x6ff   : > { %1928 = vrsqrt.f32 %v1409_v1  ;;  %vm1416_vm10 = vweird.f32 %v1409_v1 }
 0x705   : > { %v1929_v2 = vpop.eup %1928 }
 0x706   : > { %v1411_v3 = vmul.f32 %v1929_v2, %v1409_v1  ;;  %vm1417_vm9 = vweird.f32 %v1929_v2 }
 0x707   : > { %vm1418_vm11 = vmor %vm1416_vm10, %vm1417_vm9 }
 0x708   : > { %v1412_v4 = vmul.f32 %v1929_v2, %v1411_v3 }
 0x70a   : > { %v1413_v5 = vmul.f32 0.5, %v1412_v4 }
 0x70c   : > { %v1414_v6 = vsub.f32 1.5, %v1413_v5 }
 0x70e   : > { %v1415_v7 = vmul.f32 %v1929_v2, %v1414_v6 }
 0x710   : > { %v1419_v9 = vsel %vm1418_vm11, %v1929_v2, %v1415_v7 }
 0x711   : > { %v1420_v10 = vmul.f32 %v1419_v9, %v1403_v60 }
 0x713   : > { %v1424_v12 = vmul.f32 %v1904_v8, %v1420_v10 }
 0x715   : > { %v1428_v13 = vadd.f32 %v1905_v11, %v1424_v12 }
 0x717   : > { %v1431_v14 = vsel %vm806_vm0, %v1428_v13, 0.0 }
 0x718   : > { %1432 = vadd.xlane.f32.xlu1 %v1431_v14 }
 0x78b   : > { %v1433_v15 = vpop.xlane.xlu1 %1432 }
 0x78c   : > { %v1434_v16 = vmul.f32 %v1433_v15, %v2650_v18 }
 0x78e   : > { %v1435_v17 = vsub.f32 %v1428_v13, %v1434_v16 }
 0x790   : > { %v1436_v19 = vmul.f32 %v1435_v17, %v1435_v17 }
 0x792   : > { %v1437_v20 = vsel %vm806_vm0, %v1436_v19, 0.0 }
 0x793   : > { %1438 = vadd.xlane.f32.xlu0 %v1437_v20 }
 0x806   : > { %v1439_v21 = vpop.xlane.xlu0 %1438 }
 0x807   : > { %v1440_v22 = vmul.f32 %v1439_v21, %v2650_v18  ;;  %v1907_v18 = vld [vmem:[%s2714_s18] ss:$0 sm:$0xff] }
 0x809   : > { %v1441_v23 = vadd.f32 1e-05, %v1440_v22 }
 0x80b   : > { %1930 = vrsqrt.f32 %v1441_v23  ;;  %vm1448_vm13 = vweird.f32 %v1441_v23 }
 0x811   : > { %v1931_v24 = vpop.eup %1930 }
 0x812   : > { %v1443_v25 = vmul.f32 %v1931_v24, %v1441_v23  ;;  %vm1449_vm12 = vweird.f32 %v1931_v24 }
 0x813   : > { %vm1450_vm14 = vmor %vm1448_vm13, %vm1449_vm12 }
 0x814   : > { %v1444_v26 = vmul.f32 %v1931_v24, %v1443_v25 }
 0x816   : > { %v1445_v27 = vmul.f32 0.5, %v1444_v26 }
 0x818   : > { %v1446_v28 = vsub.f32 1.5, %v1445_v27 }
 0x81a   : > { %v1447_v29 = vmul.f32 %v1931_v24, %v1446_v28 }
 0x81c   : > { %v1451_v31 = vsel %vm1450_vm14, %v1931_v24, %v1447_v29 }
 0x81d   : > { %v1452_v32 = vmul.f32 %v1451_v31, %v1435_v17 }
 0x81f   : > { %v1456_v33 = vmul.f32 %v1906_v30, %v1452_v32 }
 0x821   : > { %v1460_v34 = vadd.f32 %v1907_v18, %v1456_v33 }
 0x823   : > { %v1461_v35 = vpack.c.bf16 %v1460_v34, %v1460_v34 }
 0x825   : > { %1463 = vst.msk [vmem:[%s779_s10] sm:$0xf] %vm1462_vm15, %v1461_v35 }
 0x826 PF: > { %s2743_s26 = sld [smem:[#allocation28_spill]]  ;;  %s2744_s0 = smov %s2304_s30 }
 0x827   : > { %s2745_s30 = smov %s2747_s28 }
 0x82c   : > { %s35_s20 = sadd.s32 1, %s2743_s26  }
 0x82d   : > { %p32_p8 = scmp.ge.s32.totalorder %s35_s20, 4  }
 0x82f   :  { %34 = sbr.rel (!%p32_p8) target bundleno = 18 (0x12), region = 186 }
 0x834   :  { %1489 = vsyncpa [#allocation6], 1 }
 0x835   :  { %1491 = vsyncpa [#allocation6 + $0x1], 1 }
 0x836   :  { %1492 = vsyncpa [#allocation8], 1 }
 0x837   :  { %1493 = vsyncpa [#allocation11], 1 }
 0x838   :  { %1494 = vsyncpa [#allocation14], 1 }
 0x839   :  { %1495 = vsyncpa [#allocation17], 1 }
 0x83a   :  { %1496 = vsyncpa [#allocation20], 1 }

// kernel: encoder_forward.2
= control target key start
LH: loop header
LB: loop body
LE: loop exit
PB: predicated region body
PF: predicated region fallthrough
CT: control target
= control target key end

     0   :  { %s2651_s0 = inlined_call_operand.vmem [shape: bf16[2,8,32], index: 0, kind: input, shape index: {}]   ;;  %s2652_s1 = inlined_call_operand.vmem [shape: bf16[32,32], index: 1, kind: input, shape index: {}]   ;;  %s2653_s2 = inlined_call_operand.hbm [shape: f32[1,32], index: 2, kind: input, shape index: {}]   ;;  %s2654_s3 = inlined_call_operand.vmem [shape: bf16[32,32], index: 3, kind: input, shape index: {}]   ;;  %s2655_s4 = inlined_call_operand.hbm [shape: f32[1,32], index: 4, kind: input, shape index: {}]   ;;  %s2656_s5 = inlined_call_operand.vmem [shape: bf16[32,32], index: 5, kind: input, shape index: {}]   ;;  %s2657_s6 = inlined_call_operand.hbm [shape: f32[1,32], index: 6, kind: input, shape index: {}]   ;;  %s2658_s7 = inlined_call_operand.hbm [shape: bf16[4,8,32], index: 7, kind: input, shape index: {}]   ;;  %s2659_s8 = inlined_call_operand.hbm [shape: f32[1,32], index: 8, kind: input, shape index: {}]   ;;  %s2660_s9 = inlined_call_operand.hbm [shape: bf16[32,64], index: 9, kind: input, shape index: {}]   ;;  %s2661_s10 = inlined_call_operand.hbm [shape: f32[1,64], index: 10, kind: input, shape index: {}]   ;;  %s2662_s11 = inlined_call_operand.vmem [shape: bf16[64,32], index: 11, kind: input, shape index: {}]   ;;  %s2663_s12 = inlined_call_operand.hbm [shape: f32[1,32], index: 12, kind: input, shape index: {}]   ;;  %s2664_s13 = inlined_call_operand.hbm [shape: f32[1,32], index: 13, kind: input, shape index: {}]   ;;  %s2665_s14 = inlined_call_operand.hbm [shape: f32[1,32], index: 14, kind: input, shape index: {}]   ;;  %s2666_s15 = inlined_call_operand.hbm [shape: f32[1,32], index: 15, kind: input, shape index: {}]   ;;  %s2667_s16 = inlined_call_operand.hbm [shape: f32[1,32], index: 16, kind: input, shape index: {}]   ;;  %s2668_s17 = inlined_call_operand.vmem [shape: bf16[2,8,32], index: 17, kind: output, shape index: {}]  }
   0x1   :  { %2672 = sst [smem:[#allocation32_spill]] %s2651_s0 }
   0x2   :  { %2673 = sst [smem:[#allocation33_spill]] %s2652_s1 }
   0x3   :  { %2674 = sst [smem:[#allocation34_spill]] %s2655_s4 }
   0x4   :  { %2675 = sst [smem:[#allocation35_spill]] %s2658_s7 }
   0x5   :  { %2676 = sst [smem:[#allocation36_spill]] %s2660_s9 }
   0x6   :  { %2677 = sst [smem:[#allocation37_spill]] %s2662_s11 }
   0x7   :  { %2678 = sst [smem:[#allocation38_spill]] %s2668_s17 }
   0x8   :  { %22 = vsyncpa [#allocation6], 0 }
   0x9   :  { %23 = vsyncpa [#allocation8], 0 }
   0xa   :  { %24 = vsyncpa [#allocation11], 0 }
   0xb   :  { %25 = vsyncpa [#allocation14], 0 }
   0xc   :  { %26 = vsyncpa [#allocation17], 0 }
   0xd   :  { %27 = vsyncpa [#allocation20], 0 }
   0xe   :  { %28 = vsyncpa [#allocation23], 0  ;;  %s2401_s24 = smov 0   ;;  %s2403_s25 = smov 0  }
   0xf   :  { %s2405_s26 = smov 0  }
  0x10 LB: > { %2679 = sst [smem:[#allocation31_spill]] %s2291_s26  ;;  %s1588_s0 = sadd.s32 4294967295, %s2291_s26   ;;  %s2291_s26 = sphi %s2405_s26, %s34_s26   ;;  %s2287_s25 = sphi %s2403_s25, %s2692_s25   ;;  %s2283_s24 = sphi %s2401_s24, %s2691_s24  }
  0x11   : > { %s2680_s4 = sld [smem:[#allocation34_spill]]  ;;  %p1590_p0 = scmp.ge.s32.totalorder %s2291_s26, 1 }
  0x12   : > { %p441_p1 = scmp.lt.s32.totalorder %s2291_s26, 3  ;;  %p2422_p2 = scmp.eq.s32.totalorder %s1588_s0, 0 }
  0x13   : > { %s2293_s19 = smov [#allocation7]   ;;  %s2683_s7 = sld [smem:[#allocation35_spill]] }
  0x14   : > { %p2426_p3 = pnand %p1590_p0, %p441_p1  ;;  %s473_s1 = sshll.u32 %s2293_s19, 4  ;;  %s474_s1 = int_to_ptr.vmem [resolvable:$true] %s473_s1 }
  0x15   : > { %s2294_s27 = smov [#allocation10]   ;;  %s2685_s9 = sld [smem:[#allocation36_spill]] }
  0x16   : > { %p1746_p4 = pneg %p2426_p3  ;;  %s499_s28 = sshll.u32 %s2294_s27, 4  ;;  %s500_s28 = int_to_ptr.vmem [resolvable:$true] %s499_s28 }
  0x17   : > { %s471_s29 = sshll.u32 %s2680_s4, 4  ;;  %s2295_s20 = smov 64   ;;  %s472_s29 = int_to_ptr.hbm [resolvable:$true] %s471_s29 }
  0x18   : > { %p2437_p5 = pnand %p2422_p2, %p1746_p4  ;;  %s2296_s21 = smov 4  }
  0x19   : > { %s497_s22 = sshll.u32 %s2683_s7, 4  ;;  %s2297_s7 = smov [#allocation13]   ;;  %s498_s22 = int_to_ptr.hbm [resolvable:$true] %s497_s22 }
  0x1a   : > { %1752 = dma.hbm_to_vmem [thread:$0]  (!%p2437_p5), %s472_s29, 16, %s474_s1, [#allocation8]  }
  0x1b   : > { %s523_s4 = sshll.u32 %s2685_s9, 4  ;;  %s525_s26 = sshll.u32 %s2297_s7, 4  ;;  %s524_s4 = int_to_ptr.hbm [resolvable:$true] %s523_s4  ;;  %s526_s26 = int_to_ptr.vmem [resolvable:$true] %s525_s26 }
  0x1c   : > { %1758 = dma.hbm_to_vmem [thread:$0]  (!%p2437_p5), %s498_s22, 256, %s500_s28, [#allocation11], %s2295_s20, %s2295_s20, %s2296_s21  }
  0x1d   : > { %s553_s27 = sshll.u32 %s2663_s12, 4  ;;  %s577_s1 = sshll.u32 %s2665_s14, 4  ;;  %s554_s27 = int_to_ptr.hbm [resolvable:$true] %s553_s27  ;;  %s578_s1 = int_to_ptr.hbm [resolvable:$true] %s577_s1 }
  0x1e   : > { %1764 = dma.hbm_to_vmem [thread:$0]  (!%p2437_p5), %s524_s4, 256, %s526_s26, [#allocation14], %s2295_s20, %s2295_s20, %s2296_s21  }
  0x1f   : > { %s2298_s19 = smov [#allocation16]   ;;  %s2299_s7 = smov [#allocation19]  }
  0x20   : > { %s555_s9 = sshll.u32 %s2298_s19, 4  ;;  %s579_s22 = sshll.u32 %s2299_s7, 4  ;;  %s556_s9 = int_to_ptr.vmem [resolvable:$true] %s555_s9  ;;  %s580_s22 = int_to_ptr.vmem [resolvable:$true] %s579_s22 }
  0x21   : > { %1770 = dma.hbm_to_vmem [thread:$0]  (!%p2437_p5), %s554_s27, 16, %s556_s9, [#allocation17]  }
  0x22   : > { %1776 = dma.hbm_to_vmem [thread:$0]  (!%p2437_p5), %s578_s1, 16, %s580_s22, [#allocation20]  }
  0x23   : > { %s46_s11 = sadd.s32 1, %s2287_s25  ;;  %s456_s4 = sshll.u32 %s2653_s2, 4  ;;  %s457_s4 = int_to_ptr.hbm [resolvable:$true] %s456_s4 }
  0x24   : > { %p48_p6 = scmp.ge.s32.totalorder %s46_s11, 2  ;;  %s486_s21 = sshll.u32 %s2657_s6, 4  ;;  %s487_s21 = int_to_ptr.hbm [resolvable:$true] %s486_s21 }
  0x25   : > { %s2300_s9 = smov [#allocation5]   ;;  %s2301_s0 = smov [#allocation9]  }
  0x26   : > { %s2694_s11 = smov (%p48_p6, %s46_s11), 0  ;;  %s458_s27 = sshll.u32 %s2300_s9, 4  ;;  %s459_s27 = int_to_ptr.vmem [resolvable:$true] %s458_s27 }
  0x27   : > { %1749 = dma.hbm_to_vmem [thread:$0]  (!%p2437_p5), %s457_s4, 16, %s459_s27, [#allocation6]  }
  0x28   : > { %s488_s29 = sshll.u32 %s2301_s0, 4  ;;  %s512_s7 = sshll.u32 %s2659_s8, 4  ;;  %s489_s29 = int_to_ptr.vmem [resolvable:$true] %s488_s29  ;;  %s513_s7 = int_to_ptr.hbm [resolvable:$true] %s512_s7 }
  0x29   : > { %1755 = dma.hbm_to_vmem [thread:$0]  (!%p2437_p5), %s487_s21, 16, %s489_s29, [#allocation8]  }
  0x2a   : > { %s538_s28 = sshll.u32 %s2661_s10, 4  ;;  %s2302_s26 = smov [#allocation12]   ;;  %s539_s28 = int_to_ptr.hbm [resolvable:$true] %s538_s28 }
  0x2b   : > { %s514_s20 = sshll.u32 %s2302_s26, 4  ;;  %s2303_s4 = smov [#allocation15]   ;;  %s515_s20 = int_to_ptr.vmem [resolvable:$true] %s514_s20 }
  0x2c   : > { %1761 = dma.hbm_to_vmem [thread:$0]  (!%p2437_p5), %s513_s7, 16, %s515_s20, [#allocation11]  }
  0x2d   : > { %s540_s9 = sshll.u32 %s2303_s4, 4  ;;  %s565_s1 = sshll.u32 %s2664_s13, 4  ;;  %s541_s9 = int_to_ptr.vmem [resolvable:$true] %s540_s9  ;;  %s566_s1 = int_to_ptr.hbm [resolvable:$true] %s565_s1 }
  0x2e   : > { %1767 = dma.hbm_to_vmem [thread:$0]  (!%p2437_p5), %s539_s28, 16, %s541_s9, [#allocation14]  }
  0x2f   : > { %s589_s19 = sshll.u32 %s2666_s15, 4  ;;  %s2304_s22 = smov [#allocation18]   ;;  %s590_s19 = int_to_ptr.hbm [resolvable:$true] %s589_s19 }
  0x30   : > { %s567_s17 = sshll.u32 %s2304_s22, 4  ;;  %s2305_s7 = smov [#allocation21]   ;;  %s568_s17 = int_to_ptr.vmem [resolvable:$true] %s567_s17 }
  0x31   : > { %1773 = dma.hbm_to_vmem [thread:$0]  (!%p2437_p5), %s566_s1, 16, %s568_s17, [#allocation17]  }
  0x32   : > { %s591_s26 = sshll.u32 %s2305_s7, 4  ;;  %s601_s27 = sshll.u32 %s2667_s16, 4  ;;  %s592_s26 = int_to_ptr.vmem [resolvable:$true] %s591_s26  ;;  %s602_s27 = int_to_ptr.hbm [resolvable:$true] %s601_s27 }
  0x33   : > { %1779 = dma.hbm_to_vmem [thread:$0]  (!%p2437_p5), %s590_s19, 16, %s592_s26, [#allocation20]  }
  0x34   : > { %s2306_s28 = smov [#allocation22]   ;;  %623 = sbr.rel (%p2426_p3) target bundleno = 1812 (0x714), region = 88 }
  0x35   : > { %s603_s9 = sshll.u32 %s2306_s28, 4  ;;  %s604_s9 = int_to_ptr.vmem [resolvable:$true] %s603_s9 }
  0x36   : > { %1782 = dma.hbm_to_vmem [thread:$0]  (!%p2437_p5), %s602_s27, 16, %s604_s9, [#allocation23]  }
  0x39   : > { %2254 = dma.done.wait (%p2422_p2), [#allocation6], 16  }
  0x3a   : > { %2256 = vsyncadd (%p2422_p2), [#allocation6], 4294967280 }
  0x3b   : > { %2258 = dma.done.wait (%p2422_p2), [#allocation8], 32  }
  0x3c   : > { %2260 = vsyncadd (%p2422_p2), [#allocation8], 4294967264 }
  0x3d   : > { %2262 = dma.done.wait (%p2422_p2), [#allocation11], 272  }
  0x3e   : > { %2264 = vsyncadd (%p2422_p2), [#allocation11], 4294967024 }
  0x3f   : > { %2266 = dma.done.wait (%p2422_p2), [#allocation14], 272  }
  0x40   : > { %2268 = vsyncadd (%p2422_p2), [#allocation14], 4294967024 }
  0x41   : > { %2270 = dma.done.wait (%p2422_p2), [#allocation17], 32  }
  0x42   : > { %2272 = vsyncadd (%p2422_p2), [#allocation17], 4294967264 }
  0x43   : > { %2274 = dma.done.wait (%p2422_p2), [#allocation20], 32  }
  0x44   : > { %2276 = vsyncadd (%p2422_p2), [#allocation20], 4294967264 }
  0x45   : > { %2278 = dma.done.wait (%p2422_p2), [#allocation23], 16  }
  0x46   : > { %2280 = vsyncadd (%p2422_p2), [#allocation23], 4294967280  ;;  %p732_p7 = scmp.lt.s32.totalorder %s2283_s24, 1  ;;  %v1689_v0 = vld [vmem:[%s2654_s3 + $0x8] sm:$0xff]  ;;  %s2686_s21 = sld [smem:[#allocation33_spill]]  ;;  %v1688_v2 = vld [vmem:[%s2654_s3] sm:$0xff] }
  0x47   : > { %831 = vmatpush.bf16.msra.mxu1 %v1689_v0  ;;  %s2687_s20 = sld [smem:[#allocation32_spill]]  ;;  %vm769_vm0 = vcmask 261120   ;;  %v1849_v5 = vld [vmem:[#allocation7] ss:$0 sm:$0xff]  ;;  %v1850_v6 = vld [vmem:[#allocation5] ss:$0 sm:$0xff] }
  0x48   : > { %s2696_s24 = smov (!%p732_p7, %s2283_s24), 1  ;;  %vm787_vm1 = vcmask 60416   ;;  %s2307_s27 = smov 120   ;;  %vm924_vm2 = vcmask 64512   ;;  %v1691_v18 = vld [vmem:[%s2656_s5 + $0x8] sm:$0xff]  ;;  %v1690_v19 = vld [vmem:[%s2656_s5] sm:$0xff] }
  0x49   : > { %s1617_s29 = sshll.u32 %s2696_s24, 2  ;;  %s2308_s28 = smov 104   ;;  %882 = vmatpush.bf16.msra.mxu2 %v1691_v18  ;;  %v1851_v38 = vld [vmem:[#allocation9] ss:$0 sm:$0xff]  ;;  %vm1052_vm3 = vcmask 1043456   ;;  %vm1342_vm8 = vcmask 523264  }
  0x4a   : > { %s2309_s9 = smov 112   ;;  %s2688_s30 = sld [smem:[#allocation37_spill]]  ;;  %vm1393_vm12 = vcmask 257024  }
  0x4b   : > { %832 = vmatpush.bf16.msra.mxu1 %v1688_v2  ;;  %s2689_s18 = sld [smem:[#allocation38_spill]] }
  0x4c   : > { %v1687_v1 = vld [vmem:[%s2686_s21 + $0x8] sm:$0xff]  ;;  %v1686_v3 = vld [vmem:[%s2686_s21] sm:$0xff] }
  0x4d   : > { %779 = vmatpush.bf16.msra.mxu0 %v1687_v1  ;;  %s2550_s4 = scalar_lea.vmem %s2687_s20, %s1617_s29  ;;  %883 = vmatpush.bf16.msra.mxu2 %v1690_v19 }
  0x4e   : > { %v748_v4 = vld [vmem:[%s2550_s4] sm:$0xf] }
  0x4f   : > { %1636 = vmatmul.msk.bf16.vlgmr.msra.gmra.mxu1 %vm769_vm0, %v748_v4 }
  0x50   : > { %1645 = vmatmul.msk.bf16.vlgmr.msra.gmra.mxu2 %vm769_vm0, %v748_v4 }
  0x51   : > { %780 = vmatpush.bf16.msra.mxu0 %v1686_v3  ;;  %s742_s23 = scalar_lea.vmem %s2689_s18, %s1617_s29 }
  0x54   : > { %1627 = vmatmul.msk.bf16.vlgmr.msra.gmra.mxu0 %vm769_vm0, %v748_v4 }
  0xcc   : > { %v834_v7 = vpop.f32.mrf.mxu1 }
  0xcd   : > { %v835_v9 = vadd.f32 %v1849_v5, %v834_v7 }
  0xcf   : > { %v838_v11 = vpack.c.bf16 %v835_v9, %v835_v9 }
  0xd1   : > { %v782_v8 = vpop.f32.mrf.mxu0  ;;  %839 = vst.msk [vmem:[#allocation3] sm:$0xf] %vm787_vm1, %v838_v11  ;;  %841 = vrot.lane.b32.xlu1 %v838_v11, %s2307_s27  ;;  %851 = vrot.lane.b32.xlu0 %v838_v11, %s2308_s28 }
  0xd2   : > { %v783_v10 = vadd.f32 %v1850_v6, %v782_v8 }
  0xd3   : > { %v885_v39 = vpop.f32.mrf.mxu2 }
  0xd4   : > { %v786_v12 = vpack.c.bf16 %v783_v10, %v783_v10  ;;  %v836_v13 = vpop.f32.mrf.mxu1  ;;  %v886_v40 = vadd.f32 %v1851_v38, %v885_v39 }
  0xd6   : > { %788 = vst.msk [vmem:[#allocation2] sm:$0xf] %vm787_vm1, %v786_v12  ;;  %790 = vrot.lane.b32.xlu2 %v786_v12, %s2307_s27  ;;  %v889_v41 = vpack.c.bf16 %v886_v40, %v886_v40  ;;  %v1131_v40 = vld [vmem:[#allocation10 + $0x4] sm:$0xf] }
  0xd8   : > { %v916_v15 = vld [vmem:[#allocation3] sm:$0xf]  ;;  %890 = vst.msk [vmem:[#allocation4] sm:$0xf] %vm787_vm1, %v889_v41 }
  0xd9   : > { %v784_v14 = vpop.f32.mrf.mxu0  ;;  %846 = vrot.lane.b32.xlu1 %v838_v11, %s2309_s9  ;;  %800 = vrot.lane.b32.xlu0 %v786_v12, %s2308_s28  ;;  %v929_v16 = vsel %vm924_vm2, %v916_v15, 0 }
  0xda   : > { %938 = vmatpush.bf16.xpose.msra.mxu3 %v929_v16 }
  0xdb   : > { %v887_v42 = vpop.f32.mrf.mxu2 }
  0xdc   : > { %v1133_v42 = vld [vmem:[#allocation10 + $0xc] sm:$0xf] }
  0xdd   : > { %v912_v17 = vld [vmem:[#allocation2] sm:$0xf] }
  0xde   : > { %795 = vrot.lane.b32.xlu2 %v786_v12, %s2309_s9 }
  0xdf   : > { %v920_v43 = vld [vmem:[#allocation4] sm:$0xf] }
  0xe0   : > { %v1054_v44 = vsel %vm1052_vm3, %v920_v43, 0  ;;  %v1195_v43 = vsel %vm1052_vm3, %v1133_v42, 0 }
  0xe1   : > { %1646 = vmatmul.msk.bf16.vlgmr.msra.gmra.mxu3 %vm924_vm2, %v912_v17 }
  0xe2   : > { %1063 = vmatpush.bf16.msrb.mxu3 %v1054_v44  ;;  %v1132_v44 = vld [vmem:[#allocation10 + $0x8] sm:$0xf] }
 0x130   : > { %v791_v20 = vpop.permute.xlu2 %790 }
 0x131   : > { %794 = vst.msk [vmem:[#allocation2 + $0x4] sm:$0xf] %vm787_vm1, %v791_v20 }
 0x138   : > { %v796_v21 = vpop.permute.xlu2 %795  ;;  %v913_v30 = vld [vmem:[#allocation2 + $0x4] sm:$0xf] }
 0x139   : > { %799 = vst.msk [vmem:[#allocation2 + $0x8] sm:$0xf] %vm787_vm1, %v796_v21  ;;  %v1130_v21 = vld [vmem:[#allocation10] sm:$0xf] }
 0x140   : > { %v914_v34 = vld [vmem:[#allocation2 + $0x8] sm:$0xf] }
 0x143   : > { %v842_v22 = vpop.permute.xlu1 %841  ;;  %v852_v23 = vpop.permute.xlu0 %851 }
 0x144   : > { %845 = vst.msk [vmem:[#allocation3 + $0x4] sm:$0xf] %vm787_vm1, %v842_v22  ;;  %v1138_v22 = vsel %vm1052_vm3, %v1130_v21, 0 }
 0x145   : > { %855 = vst.msk [vmem:[#allocation3 + $0xc] sm:$0xf] %vm787_vm1, %v852_v23  ;;  %1147 = vmatpush.bf16.msra.mxu3 %v1138_v22 }
 0x14b   : > { %v847_v24 = vpop.permute.xlu1 %846  ;;  %v801_v25 = vpop.permute.xlu0 %800  ;;  %v917_v26 = vld [vmem:[#allocation3 + $0x4] sm:$0xf] }
 0x14c   : > { %850 = vst.msk [vmem:[#allocation3 + $0x8] sm:$0xf] %vm787_vm1, %v847_v24  ;;  %v948_v27 = vsel %vm924_vm2, %v917_v26, 0  ;;  %v919_v28 = vld [vmem:[#allocation3 + $0xc] sm:$0xf] }
 0x14d   : > { %804 = vst.msk [vmem:[#allocation2 + $0xc] sm:$0xf] %vm787_vm1, %v801_v25  ;;  %957 = vmatpush.bf16.xpose.msrb.mxu0 %v948_v27  ;;  %v986_v29 = vsel %vm924_vm2, %v919_v28, 0 }
 0x14e   : > { %995 = vmatpush.bf16.xpose.msrb.mxu2 %v986_v29 }
 0x153   : > { %v918_v31 = vld [vmem:[#allocation3 + $0x8] sm:$0xf] }
 0x154   : > { %1647 = vmatmul.msk.bf16.vlgmr.msrb.gmra.mxu0 %vm924_vm2, %v913_v30  ;;  %v915_v32 = vld [vmem:[#allocation2 + $0xc] sm:$0xf]  ;;  %v967_v33 = vsel %vm924_vm2, %v918_v31, 0 }
 0x155   : > { %1649 = vmatmul.msk.bf16.vlgmr.msrb.gmra.mxu2 %vm924_vm2, %v915_v32  ;;  %976 = vmatpush.bf16.xpose.msrb.mxu1 %v967_v33 }
 0x15c   : > { %1648 = vmatmul.msk.bf16.vlgmr.msrb.gmra.mxu1 %vm924_vm2, %v914_v34 }
 0x164   : > { %v940_v35 = vpop.f32.mrf.mxu3 }
 0x165   : > { %v1001_v36 = vsel %vm924_vm2, %v940_v35, -inf }
 0x166   : > { %1002 = vmax.xlane.f32.xlu0 %v1001_v36 }
 0x16c   : > { %v942_v37 = vpop.f32.mrf.mxu3 }
 0x1d1   : > { %v959_v45 = vpop.f32.mrf.mxu0 }
 0x1d2   : > { %v1004_v46 = vsel %vm924_vm2, %v959_v45, -inf }
 0x1d3   : > { %1005 = vmax.xlane.f32.xlu2 %v1004_v46 }
 0x1d8   : > { %v997_v47 = vpop.f32.mrf.mxu2 }
 0x1d9   : > { %v961_v48 = vpop.f32.mrf.mxu0  ;;  %v978_v49 = vpop.f32.mrf.mxu1  ;;  %v1010_v50 = vsel %vm924_vm2, %v997_v47, -inf }
 0x1da   : > { %1011 = vmax.xlane.f32.xlu1 %v1010_v50  ;;  %v1003_v51 = vpop.xlane.xlu0 %1002  ;;  %v1007_v52 = vsel %vm924_vm2, %v978_v49, -inf }
 0x1db   : > { %v1013_v53 = vsub.f32 %v940_v35, %v1003_v51  ;;  %1008 = vmax.xlane.f32.xlu2 %v1007_v52 }
 0x1dd   : > { %v1017_v54 = vmul.f32 1.442695, %v1013_v53 }
 0x1df   : > { %1859 = vpow2.f32 %v1017_v54 }
 0x1e0   : > { %v999_v55 = vpop.f32.mrf.mxu2 }
 0x1e1   : > { %v980_v56 = vpop.f32.mrf.mxu1 }
 0x1e5   : > { %v1860_v57 = vpop.eup %1859 }
 0x1e6   : > { %v1025_v58 = vsel %vm924_vm2, %v1860_v57, 0.0 }
 0x1e7   : > { %1026 = vadd.xlane.f32.xlu0 %v1025_v58 }
 0x1f3   : > { %902 = vrot.lane.b32.xlu1 %v889_v41, %s2308_s28 }
 0x1fb   : > { %892 = vrot.lane.b32.xlu0 %v889_v41, %s2307_s27 }
 0x246   : > { %v1006_v59 = vpop.xlane.xlu2 %1005 }
 0x247   : > { %v1014_v60 = vsub.f32 %v959_v45, %v1006_v59  ;;  %v1176_v45 = vsel %vm1052_vm3, %v1132_v44, 0  ;;  %v1695_v44 = vld [vmem:[%s2688_s30 + $0x8] sm:$0xff] }
 0x249   : > { %v1019_v61 = vmul.f32 1.442695, %v1014_v60 }
 0x24b   : > { %1861 = vpow2.f32 %v1019_v61 }
 0x24d   : > { %v1012_v62 = vpop.xlane.xlu1 %1011 }
 0x24e   : > { %v1016_v63 = vsub.f32 %v997_v47, %v1012_v62  ;;  %v1009_v0 = vpop.xlane.xlu2 %1008 }
 0x24f   : > { %v1015_v1 = vsub.f32 %v978_v49, %v1009_v0  ;;  %v1225_v0 = vld [vmem:[%s2550_s4] sm:$0xf] }
 0x250   : > { %v1023_v2 = vmul.f32 1.442695, %v1016_v63 }
 0x251   : > { %v1862_v3 = vpop.eup %1861  ;;  %v1021_v4 = vmul.f32 1.442695, %v1015_v1 }
 0x252   : > { %1863 = vpow2.f32 %v1023_v2  ;;  %v1028_v5 = vsel %vm924_vm2, %v1862_v3, 0.0 }
 0x253   : > { %1865 = vpow2.f32 %v1021_v4  ;;  %1029 = vadd.xlane.f32.xlu2 %v1028_v5  ;;  %v1226_v5 = vunpack.c.l.bf16 %v1225_v0 }
 0x258   : > { %v1864_v6 = vpop.eup %1863 }
 0x259   : > { %v1866_v7 = vpop.eup %1865  ;;  %v1034_v10 = vsel %vm924_vm2, %v1864_v6, 0.0 }
 0x25a   : > { %v1027_v8 = vpop.xlane.xlu0 %1026  ;;  %v1031_v9 = vsel %vm924_vm2, %v1866_v7, 0.0 }
 0x25b   : > { %1867 = vrcp.f32 %v1027_v8  ;;  %1032 = vadd.xlane.f32.xlu1 %v1031_v9  ;;  %1035 = vadd.xlane.f32.xlu2 %v1034_v10 }
 0x261   : > { %v1868_v11 = vpop.eup %1867 }
 0x262   : > { %v1041_v12 = vmul.f32 %v1868_v11, %v1860_v57 }
 0x264   : > { %v1045_v13 = vpack.c.bf16 %v1041_v12, %v1041_v12  ;;  %v2310_v12 = vmov 32.0  }
 0x265   : > { %v903_v14 = vpop.permute.xlu1 %902 }
 0x266   : > { %906 = vst.msk [vmem:[#allocation4 + $0xc] sm:$0xf] %vm787_vm1, %v903_v14  ;;  %1650 = vmatmul.msk.bf16.vlgmr.msrb.gmra.mxu3 %vm924_vm2, %v1045_v13 }
 0x26d   : > { %v893_v15 = vpop.permute.xlu0 %892  ;;  %v923_v16 = vld [vmem:[#allocation4 + $0xc] sm:$0xf] }
 0x26e   : > { %896 = vst.msk [vmem:[#allocation4 + $0x4] sm:$0xf] %vm787_vm1, %v893_v15  ;;  %v1111_v17 = vsel %vm1052_vm3, %v923_v16, 0 }
 0x26f   : > { %1120 = vmatpush.bf16.msra.mxu2 %v1111_v17 }
 0x273   : > { %897 = vrot.lane.b32.xlu2 %v889_v41, %s2309_s9  ;;  %v1157_v41 = vsel %vm1052_vm3, %v1131_v40, 0  ;;  %1204 = vmatpush.bf16.msrb.mxu2 %v1195_v43 }
 0x275   : > { %v921_v18 = vld [vmem:[#allocation4 + $0x4] sm:$0xf] }
 0x276   : > { %v1073_v19 = vsel %vm1052_vm3, %v921_v18, 0 }
 0x277   : > { %1082 = vmatpush.bf16.msra.mxu0 %v1073_v19 }
 0x27b   : > { %1166 = vmatpush.bf16.msrb.mxu0 %v1157_v41 }
 0x2c6   : > { %v1030_v20 = vpop.xlane.xlu2 %1029 }
 0x2c7   : > { %1869 = vrcp.f32 %v1030_v20 }
 0x2cd   : > { %v1870_v23 = vpop.eup %1869 }
 0x2ce   : > { %v1042_v24 = vmul.f32 %v1870_v23, %v1862_v3  ;;  %v1036_v25 = vpop.xlane.xlu2 %1035  ;;  %v1033_v27 = vpop.xlane.xlu1 %1032  ;;  %v1852_v3 = vld [vmem:[#allocation12] ss:$0 sm:$0xff] }
 0x2cf   : > { %1871 = vrcp.f32 %v1036_v25  ;;  %v1692_v25 = vld [vmem:[#allocation13] sm:$0xff] }
 0x2d0   : > { %v1046_v26 = vpack.c.bf16 %v1042_v24, %v1042_v24  ;;  %1873 = vrcp.f32 %v1033_v27  ;;  %v1693_v24 = vld [vmem:[#allocation13 + $0x8] sm:$0xff] }
 0x2d1   : > { %1875 = vrcp.f32 %v2310_v12  ;;  %1297 = vmatpush.bf16.msrb.mxu3 %v1693_v24 }
 0x2d2   : > { %1651 = vmatmul.msk.bf16.vlgmr.msra.gmra.mxu0 %vm924_vm2, %v1046_v26  ;;  %v1697_v26 = vld [vmem:[%s2688_s30 + $0x18] sm:$0xff] }
 0x2d3   : > { %1350 = vmatpush.bf16.msra.mxu0 %v1697_v26 }
 0x2d5   : > { %v1872_v28 = vpop.eup %1871  ;;  %1298 = vmatpush.bf16.msrb.mxu3 %v1692_v25 }
 0x2d6   : > { %v1044_v29 = vmul.f32 %v1872_v28, %v1864_v6  ;;  %v898_v30 = vpop.permute.xlu2 %897  ;;  %v1874_v32 = vpop.eup %1873 }
 0x2d7   : > { %901 = vst.msk [vmem:[#allocation4 + $0x8] sm:$0xf] %vm787_vm1, %v898_v30  ;;  %v1043_v33 = vmul.f32 %v1874_v32, %v1866_v7  ;;  %v1876_v13 = vpop.eup %1875 }
 0x2d8   : > { %v1048_v31 = vpack.c.bf16 %v1044_v29, %v1044_v29  ;;  %v1234_v14 = vmul.f32 32.0, %v1876_v13  ;;  %vm1238_vm4 = vweird.f32 %v1876_v13  ;;  %v1696_v29 = vld [vmem:[%s2688_s30 + $0x10] sm:$0xff] }
 0x2d9   : > { %v1047_v36 = vpack.c.bf16 %v1043_v33, %v1043_v33  ;;  %1351 = vmatpush.bf16.msra.mxu0 %v1696_v29 }
 0x2da   : > { %1653 = vmatmul.msk.bf16.vlgmr.msra.gmra.mxu2 %vm924_vm2, %v1048_v31  ;;  %v1235_v15 = vsub.f32 1.0, %v1234_v14 }
 0x2dc   : > { %v1236_v16 = vmul.f32 %v1876_v13, %v1235_v15 }
 0x2dd   : > { %1352 = vmatpush.bf16.msra.mxu0 %v1695_v44 }
 0x2de   : > { %v922_v34 = vld [vmem:[#allocation4 + $0x8] sm:$0xf]  ;;  %v1237_v17 = vadd.f32 %v1876_v13, %v1236_v16 }
 0x2df   : > { %v1092_v35 = vsel %vm1052_vm3, %v922_v34, 0 }
 0x2e0   : > { %1101 = vmatpush.bf16.msra.mxu1 %v1092_v35  ;;  %v1239_v18 = vsel %vm1238_vm4, %v1876_v13, %v1237_v17 }
 0x2e3   : > { %1652 = vmatmul.msk.bf16.vlgmr.msra.gmra.mxu1 %vm924_vm2, %v1047_v36 }
 0x2e4   : > { %1185 = vmatpush.bf16.msrb.mxu1 %v1176_v45  ;;  %v1694_v45 = vld [vmem:[%s2688_s30] sm:$0xff] }
 0x2e5   : > { %1353 = vmatpush.bf16.msra.mxu0 %v1694_v45 }
 0x2e9   : > { %v1065_v37 = vpop.f32.mrf.mxu3 }
 0x2ea   : > { %v1126_v38 = vpack.c.bf16 %v1065_v37, %v1065_v37  ;;  %v1853_v37 = vld [vmem:[#allocation18] ss:$0 sm:$0xff] }
 0x2ec   : > { %1654 = vmatmul.msk.bf16.vlgmr.msra.gmra.mxu3 %vm924_vm2, %v1126_v38 }
 0x2f1   : > { %v1067_v39 = vpop.f32.mrf.mxu3 }
 0x2f2   : > { %v1854_v39 = vld [vmem:[#allocation19] ss:$0 sm:$0xff] }
 0x34f   : > { %v1084_v46 = vpop.f32.mrf.mxu0 }
 0x350   : > { %v1127_v47 = vpack.c.bf16 %v1084_v46, %v1084_v46  ;;  %v1855_v46 = vld [vmem:[#allocation15] ss:$0 sm:$0xff] }
 0x352   : > { %1655 = vmatmul.msk.bf16.vlgmr.msrb.gmra.mxu0 %vm924_vm2, %v1127_v47 }
 0x357   : > { %v1086_v48 = vpop.f32.mrf.mxu0 }
 0x35d   : > { %v1122_v49 = vpop.f32.mrf.mxu2 }
 0x35e   : > { %v1129_v50 = vpack.c.bf16 %v1122_v49, %v1122_v49 }
 0x360   : > { %v1103_v51 = vpop.f32.mrf.mxu1  ;;  %1657 = vmatmul.msk.bf16.vlgmr.msrb.gmra.mxu2 %vm924_vm2, %v1129_v50 }
 0x361   : > { %v1128_v52 = vpack.c.bf16 %v1103_v51, %v1103_v51 }
 0x363   : > { %1656 = vmatmul.msk.bf16.vlgmr.msrb.gmra.mxu1 %vm924_vm2, %v1128_v52  ;;  %v1856_v52 = vld [vmem:[#allocation16] ss:$0 sm:$0xff] }
 0x365   : > { %v1124_v53 = vpop.f32.mrf.mxu2 }
 0x368   : > { %v1105_v54 = vpop.f32.mrf.mxu1 }
 0x36f   : > { %v1149_v55 = vpop.f32.mrf.mxu3 }
 0x370   : > { %v1211_v60 = vsel %vm769_vm0, %v1149_v55, 0.0 }
 0x377   : > { %v1151_v56 = vpop.f32.mrf.mxu3 }
 0x3cf   : > { %v1168_v57 = vpop.f32.mrf.mxu0 }
 0x3d0   : > { %v1212_v59 = vsel %vm769_vm0, %v1168_v57, 0.0 }
 0x3d1   : > { %v1213_v61 = vadd.f32 %v1212_v59, %v1211_v60 }
 0x3d7   : > { %v1170_v58 = vpop.f32.mrf.mxu0 }
 0x3e0   : > { %v1187_v62 = vpop.f32.mrf.mxu1 }
 0x3e1   : > { %v1214_v63 = vsel %vm769_vm0, %v1187_v62, 0.0 }
 0x3e2   : > { %v1215_v1 = vadd.f32 %v1214_v63, %v1213_v61 }
 0x3e3   : > { %v1206_v2 = vpop.f32.mrf.mxu2 }
 0x3e4   : > { %v1216_v4 = vsel %vm769_vm0, %v1206_v2, 0.0 }
 0x3e5   : > { %v1217_v6 = vadd.f32 %v1216_v4, %v1215_v1 }
 0x3e7   : > { %v1222_v7 = vadd.f32 %v1852_v3, %v1217_v6 }
 0x3e8   : > { %v1189_v8 = vpop.f32.mrf.mxu1 }
 0x3e9   : > { %v1227_v9 = vadd.f32 %v1226_v5, %v1222_v7  ;;  %v1857_v8 = vld [vmem:[#allocation21] ss:$0 sm:$0xff] }
 0x3eb   : > { %v1208_v10 = vpop.f32.mrf.mxu2  ;;  %v1230_v11 = vsel %vm769_vm0, %v1227_v9, 0.0 }
 0x3ec   : > { %1231 = vadd.xlane.f32.xlu0 %v1230_v11  ;;  %v1858_v10 = vld [vmem:[#allocation22] ss:$0 sm:$0xff] }
 0x45f   : > { %v1232_v19 = vpop.xlane.xlu0 %1231 }
 0x460   : > { %v1240_v20 = vmul.f32 %v1239_v18, %v1232_v19 }
 0x462   : > { %v1241_v21 = vsub.f32 %v1227_v9, %v1240_v20 }
 0x464   : > { %v1242_v22 = vmul.f32 %v1241_v21, %v1241_v21 }
 0x466   : > { %v1243_v23 = vsel %vm769_vm0, %v1242_v22, 0.0 }
 0x467   : > { %1244 = vadd.xlane.f32.xlu2 %v1243_v23 }
 0x4da   : > { %v1245_v27 = vpop.xlane.xlu2 %1244 }
 0x4db   : > { %v1246_v28 = vmul.f32 %v1245_v27, %v1239_v18 }
 0x4dd   : > { %v1247_v30 = vadd.f32 1e-05, %v1246_v28 }
 0x4df   : > { %1877 = vrsqrt.f32 %v1247_v30  ;;  %vm1254_vm6 = vweird.f32 %v1247_v30 }
 0x4e5   : > { %v1878_v31 = vpop.eup %1877 }
 0x4e6   : > { %v1249_v32 = vmul.f32 %v1878_v31, %v1247_v30  ;;  %vm1255_vm5 = vweird.f32 %v1878_v31 }
 0x4e7   : > { %vm1256_vm7 = vmor %vm1254_vm6, %vm1255_vm5 }
 0x4e8   : > { %v1250_v33 = vmul.f32 %v1878_v31, %v1249_v32 }
 0x4ea   : > { %v1251_v34 = vmul.f32 0.5, %v1250_v33 }
 0x4ec   : > { %v1252_v35 = vsub.f32 1.5, %v1251_v34 }
 0x4ee   : > { %v1253_v36 = vmul.f32 %v1878_v31, %v1252_v35 }
 0x4f0   : > { %v1257_v38 = vsel %vm1256_vm7, %v1878_v31, %v1253_v36 }
 0x4f1   : > { %v1258_v40 = vmul.f32 %v1257_v38, %v1241_v21 }
 0x4f3   : > { %v1262_v41 = vmul.f32 %v1853_v37, %v1258_v40 }
 0x4f5   : > { %v1266_v42 = vadd.f32 %v1854_v39, %v1262_v41 }
 0x4f7   : > { %v1267_v43 = vpack.c.bf16 %v1266_v42, %v1266_v42 }
 0x4f9   : > { %1666 = vmatmul.msk.bf16.vlgmr.msrb.gmra.mxu3 %vm769_vm0, %v1267_v43 }
 0x57c   : > { %v1300_v47 = vpop.f32.mrf.mxu3 }
 0x57d   : > { %v1301_v48 = vadd.f32 %v1855_v46, %v1300_v47 }
 0x57f   : > { %v1304_v49 = vmax.f32 %v1301_v48, 0.0 }
 0x581   : > { %v1305_v50 = vpack.c.bf16 %v1304_v49, %v1304_v49 }
 0x583   : > { %1683 = vmatmul.msk.bf16.vlgmr.msra.gmra.mxu0 %vm1342_vm8, %v1305_v50 }
 0x584   : > { %v1302_v51 = vpop.f32.mrf.mxu3 }
 0x600   : > { %v1355_v53 = vpop.f32.mrf.mxu0 }
 0x601   : > { %v1356_v54 = vadd.f32 %v1856_v52, %v1355_v53 }
 0x603   : > { %v1359_v55 = vadd.f32 %v1356_v54, %v1266_v42 }
 0x605   : > { %v1362_v56 = vsel %vm769_vm0, %v1359_v55, 0.0 }
 0x606   : > { %1363 = vadd.xlane.f32.xlu1 %v1362_v56 }
 0x608   : > { %v1357_v57 = vpop.f32.mrf.mxu0 }
 0x679   : > { %v1364_v58 = vpop.xlane.xlu1 %1363 }
 0x67a   : > { %v1365_v59 = vmul.f32 %v1364_v58, %v1239_v18 }
 0x67c   : > { %v1366_v60 = vsub.f32 %v1359_v55, %v1365_v59 }
 0x67e   : > { %v1367_v61 = vmul.f32 %v1366_v60, %v1366_v60 }
 0x680   : > { %v1368_v62 = vsel %vm769_vm0, %v1367_v61, 0.0 }
 0x681   : > { %1369 = vadd.xlane.f32.xlu0 %v1368_v62 }
 0x6f4   : > { %v1370_v63 = vpop.xlane.xlu0 %1369 }
 0x6f5   : > { %v1371_v0 = vmul.f32 %v1370_v63, %v1239_v18 }
 0x6f7   : > { %v1372_v1 = vadd.f32 1e-05, %v1371_v0 }
 0x6f9   : > { %1879 = vrsqrt.f32 %v1372_v1  ;;  %vm1379_vm10 = vweird.f32 %v1372_v1 }
 0x6ff   : > { %v1880_v2 = vpop.eup %1879 }
 0x700   : > { %v1374_v3 = vmul.f32 %v1880_v2, %v1372_v1  ;;  %vm1380_vm9 = vweird.f32 %v1880_v2 }
 0x701   : > { %vm1381_vm11 = vmor %vm1379_vm10, %vm1380_vm9 }
 0x702   : > { %v1375_v4 = vmul.f32 %v1880_v2, %v1374_v3 }
 0x704   : > { %v1376_v5 = vmul.f32 0.5, %v1375_v4 }
 0x706   : > { %v1377_v6 = vsub.f32 1.5, %v1376_v5 }
 0x708   : > { %v1378_v7 = vmul.f32 %v1880_v2, %v1377_v6 }
 0x70a   : > { %v1382_v9 = vsel %vm1381_vm11, %v1880_v2, %v1378_v7 }
 0x70b   : > { %v1383_v11 = vmul.f32 %v1382_v9, %v1366_v60 }
 0x70d   : > { %v1387_v12 = vmul.f32 %v1857_v8, %v1383_v11 }
 0x70f   : > { %v1391_v13 = vadd.f32 %v1858_v10, %v1387_v12 }
 0x711   : > { %v1392_v14 = vpack.c.bf16 %v1391_v13, %v1391_v13 }
 0x713   : > { %1394 = vst.msk [vmem:[%s742_s23] sm:$0xf] %vm1393_vm12, %v1392_v14 }
 0x714 PF: > { %s2690_s0 = sld [smem:[#allocation31_spill]]  ;;  %s2691_s24 = smov %s2287_s25 }
 0x715   : > { %s2692_s25 = smov %s2694_s11 }
 0x71a   : > { %s34_s26 = sadd.s32 1, %s2690_s0  }
 0x71b   : > { %p31_p8 = scmp.ge.s32.totalorder %s34_s26, 4  }
 0x71d   :  { %33 = sbr.rel (!%p31_p8) target bundleno = 16 (0x10), region = 182 }
 0x722   :  { %1420 = vsyncpa [#allocation6], 1 }
 0x723   :  { %1422 = vsyncpa [#allocation6 + $0x1], 1 }
 0x724   :  { %1423 = vsyncpa [#allocation8], 1 }
 0x725   :  { %1424 = vsyncpa [#allocation11], 1 }
 0x726   :  { %1425 = vsyncpa [#allocation14], 1 }
 0x727   :  { %1426 = vsyncpa [#allocation17], 1 }
 0x728   :  { %1427 = vsyncpa [#allocation20], 1 }
 0x729   :  { %1428 = vsyncpa [#allocation23], 1 }

</bundles_post_ra>
